<compile_context>
chip_gen: v5e
topology: v5e:2x2
jax: 0.10.0
libtpu: 0.0.40
codegen_flags: <defaults>
</compile_context>

<pallas_src>
import functools

import jax
import jax.numpy as jnp
from jax.experimental import pallas as pl
from jax.experimental.pallas import tpu as pltpu


LANE = 128


def _round_up(x, m):
    return (x + m - 1) // m * m


def _pad2(a, rows, cols):
    return jnp.pad(a, ((0, rows - a.shape[0]), (0, cols - a.shape[1])))


def _vmem_budget_bytes():
    """~85% of this generation's physical VMEM (v5e/v6e ~109 MiB, v7x ~54 MiB)."""
    cap = 64 * 1024 * 1024  # conservative default (v7x physical VMEM per TC)
    try:
        cap = int(pltpu.get_tpu_info().vmem_capacity_bytes)
    except Exception:
        pass
    return int(cap * 0.85)


# --------------------------- static phase schedule --------------------------- #

def _build_schedule(f_in_p, hid_p):
    """Build the static per-phase schedule (list of dicts of Python values).

    Every phase reads scratch buffer `1 - nxt` (or the streamed X0 block) and
    writes buffer `nxt`; `nxt` flips after each phase.  Phase 1 is always the
    first hop phase (the one that streams + caches S).
    """
    num_layers = len(hid_p)
    widths_in = [f_in_p] + hid_p[:-1]
    phases = []
    nxt = 0

    def add(**kw):
        nonlocal nxt
        kw.setdefault("src_x0", False)
        kw.setdefault("finalize", False)
        kw.setdefault("last", False)
        kw["in_buf"], kw["out_buf"] = 1 - nxt, nxt
        phases.append(kw)
        nxt = 1 - nxt

    for l in range(num_layers):
        fin, fout = widths_in[l], hid_p[l]
        last = (l == num_layers - 1)
        if fout <= fin:
            # project first: both N^2-cost hops run at the narrower width fout.
            add(op="proj", layer=l, fin=fin, fout=fout, src_x0=(l == 0))
            add(op="hop", layer=l, fin=fout, fout=fout)
            add(op="hop", layer=l, fin=fout, fout=fout, finalize=True, last=last)
        else:
            # hop first: hops run at the narrower input width fin.
            if l == 0:
                add(op="ingest", layer=l, fin=fin, fout=fin, src_x0=True)
            add(op="hop", layer=l, fin=fin, fout=fin)
            add(op="hop", layer=l, fin=fin, fout=fin)
            add(op="proj", layer=l, fin=fin, fout=fout, finalize=True, last=last)

    f_max_p = max(ph["fout"] for ph in phases)
    assert phases[1]["op"] == "hop"  # S streaming phase is always phase 1
    return phases, f_max_p


# ----------------------------- fused Pallas kernel --------------------------- #

def _fused_sgc_kernel(*refs, schedule, num_layers, row_tile):
    """One (phase, row-tile) grid step of the fused SGCExtract forward.

    refs = [S_blk, X0_blk, W0, b0, ..., W_{L-1}, b_{L-1}, Wf, bf,   (inputs)
            emb_blk, out_blk,                                       (outputs)
            s_cache, buf0, buf1]                                    (scratch)
    """
    s_ref, x_ref = refs[0], refs[1]
    layer_refs = refs[2:2 + 2 * num_layers]
    wf_ref = refs[2 + 2 * num_layers]
    bf_ref = refs[3 + 2 * num_layers]
    emb_ref = refs[4 + 2 * num_layers]
    out_ref = refs[5 + 2 * num_layers]
    s_cache, buf0, buf1 = refs[6 + 2 * num_layers:]
    bufs = (buf0, buf1)

    phase = pl.program_id(0)
    i = pl.program_id(1)
    row0 = pl.multiple_of(i * row_tile, row_tile)

    def run_phase(k, ph):
        fin, fout = ph["fin"], ph["fout"]

        if ph["op"] == "ingest":
            # Only used when layer 0 is hop-first: copy X0 rows into scratch.
            bufs[ph["out_buf"]][pl.ds(row0, row_tile), :fout] = x_ref[...]
            return

        if ph["op"] == "hop":
            if k == 1:
                # First hop phase: consume the streamed S row block and cache it
                # so later hops read S from VMEM (S is read from HBM once, and
                # the DMA is pipelined against this phase's MXU work).
                s_blk = s_ref[...]
                s_cache[pl.ds(row0, row_tile), :] = s_blk
            else:
                s_blk = s_cache[pl.ds(row0, row_tile), :]
            src = bufs[ph["in_buf"]][:, :fin]            # full previous activation
            acc = jnp.dot(s_blk, src, preferred_element_type=jnp.float32)
        else:  # "proj" (row-local)
            if ph["src_x0"]:
                src = x_ref[...]                         # streamed X0 row block
            else:
                src = bufs[ph["in_buf"]][pl.ds(row0, row_tile), :fin]
            w = layer_refs[2 * ph["layer"]][...]
            acc = jnp.dot(src, w, preferred_element_type=jnp.float32)

        if ph["finalize"]:                               # last phase of a layer
            b = layer_refs[2 * ph["layer"] + 1][...]
            acc = jnp.maximum(acc + b, 0.0)

        if ph["last"]:
            # Final phase of the last layer: write embedding + fused fc logits.
            emb_ref[...] = acc
            out_ref[...] = (
                jnp.dot(acc.astype(jnp.bfloat16), wf_ref[...],
                        preferred_element_type=jnp.float32) + bf_ref[...])
        else:
            bufs[ph["out_buf"]][pl.ds(row0, row_tile), :fout] = acc.astype(jnp.bfloat16)

    for k, ph in enumerate(schedule):
        pl.when(phase == k)(functools.partial(run_phase, k, ph))


# ------------------------------ glue (plain JAX) ----------------------------- #

def build_norm_adj(edge_index, num_nodes):
    """Dense D^-1/2 (A + I) D^-1/2, matching PyG gcn_norm(add_self_loops=True)."""
    src, dst = edge_index[0], edge_index[1]
    not_loop = (src != dst).astype(jnp.float32)
    a = jnp.zeros((num_nodes, num_nodes), jnp.float32).at[dst, src].add(not_loop)
    a = a + jnp.eye(num_nodes, dtype=jnp.float32)
    deg = a.sum(axis=1)
    dinv = jnp.where(deg > 0, 1.0 / jnp.sqrt(deg), 0.0)
    return dinv[:, None] * a * dinv[None, :]


def init_params(key, in_dim, out_dim, hidden_dim):
    """Deterministic synthetic parameters (Glorot-ish), stored as (in, out)."""
    dims = [in_dim] + list(hidden_dim)
    params = {"layers": [], "fc": None}
    for i in range(len(dims) - 1):
        key, kw, kb = jax.random.split(key, 3)
        fan_in, fan_out = dims[i], dims[i + 1]
        scale = jnp.sqrt(2.0 / (fan_in + fan_out))
        w = jax.random.normal(kw, (fan_in, fan_out), jnp.float32) * scale
        b = jax.random.normal(kb, (1, fan_out), jnp.float32) * 0.01
        params["layers"].append((w, b))
    key, kw, kb = jax.random.split(key, 3)
    scale = jnp.sqrt(2.0 / (dims[-1] + out_dim))
    wf = jax.random.normal(kw, (dims[-1], out_dim), jnp.float32) * scale
    bf = jax.random.normal(kb, (1, out_dim), jnp.float32) * 0.01
    params["fc"] = (wf, bf)
    return params


def sgc_extract_forward(params, x, edge_index, *, row_tile=None):
    """Mirrors SGCExtract.forward. Returns (embedding, logits)."""
    n, f_in = x.shape
    layers = params["layers"]
    wf, bf = params["fc"]
    num_layers = len(layers)
    assert num_layers >= 1, "SGCExtract needs at least one SGConv layer"
    hidden_last = layers[-1][0].shape[1]
    out_dim = wf.shape[1]

    s = build_norm_adj(edge_index, n)

    # Pad to lane-dense slabs; bf16 MXU operands, f32 biases.
    n_p = _round_up(n, LANE)
    f_in_p = _round_up(f_in, LANE)
    hid_p = [_round_up(w.shape[1], LANE) for w, _ in layers]
    out_p = _round_up(out_dim, LANE)
    widths_in = [f_in_p] + hid_p[:-1]

    # Row tile: prefer 256 (feeds the 256-wide MXU on v6e/v7x), fall back to 128.
    if row_tile is None:
        row_tile = 256 if (n_p % 256 == 0) else 128
    num_row_tiles = n_p // row_tile

    schedule, f_max_p = _build_schedule(f_in_p, hid_p)
    num_phases = len(schedule)
    last_phase = num_phases - 1
    r_blocks = num_row_tiles

    s_pad = _pad2(s, n_p, n_p).astype(jnp.bfloat16)
    x_pad = _pad2(x, n_p, f_in_p).astype(jnp.bfloat16)

    ops = [s_pad, x_pad]
    for li, (w, b) in enumerate(layers):
        ops.append(_pad2(w, widths_in[li], hid_p[li]).astype(jnp.bfloat16))
        ops.append(_pad2(b, 1, hid_p[li]).astype(jnp.float32))
    ops.append(_pad2(wf, hid_p[-1], out_p).astype(jnp.bfloat16))
    ops.append(_pad2(bf, 1, out_p).astype(jnp.float32))

    # ---- phase-dependent index maps (S / X0 are each read from HBM once) ----
    def s_index_map(p, i):
        # phase 0: pre-stage block 0; phase 1 (first hop): stream row blocks;
        # later phases: pin to the last streamed block (no re-fetch).
        row = jnp.where(p == 1, i, jnp.where(p < 1, 0, r_blocks - 1))
        return (row, 0)

    def x_index_map(p, i):
        return (jnp.where(p == 0, i, r_blocks - 1), 0)

    def out_index_map(p, i):
        return (jnp.where(p == last_phase, i, 0), 0)

    const2d = lambda p, i: (0, 0)

    in_specs = [
        pl.BlockSpec((row_tile, n_p), s_index_map),
        pl.BlockSpec((row_tile, f_in_p), x_index_map),
    ]
    for li in range(num_layers):
        in_specs.append(pl.BlockSpec((widths_in[li], hid_p[li]), const2d))
        in_specs.append(pl.BlockSpec((1, hid_p[li]), const2d))
    in_specs.append(pl.BlockSpec((hid_p[-1], out_p), const2d))
    in_specs.append(pl.BlockSpec((1, out_p), const2d))

    out_specs = (pl.BlockSpec((row_tile, hid_p[-1]), out_index_map),
                 pl.BlockSpec((row_tile, out_p), out_index_map))

    scratch_shapes = [
        pltpu.VMEM((n_p, n_p), jnp.bfloat16),       # resident S cache
        pltpu.VMEM((n_p, f_max_p), jnp.bfloat16),   # activation ping
        pltpu.VMEM((n_p, f_max_p), jnp.bfloat16),   # activation pong
    ]

    # ---- cost estimate + VMEM budget ----
    flops = 2 * n_p * hid_p[-1] * out_p             # fc epilogue
    for ph in schedule:
        if ph["op"] == "hop":
            flops += 2 * n_p * n_p * ph["fin"]
        elif ph["op"] == "proj":
            flops += 2 * n_p * ph["fin"] * ph["fout"]
    bytes_accessed = sum(int(o.size) * o.dtype.itemsize for o in ops)
    bytes_accessed += n_p * hid_p[-1] * 4 + n_p * out_p * 4

    need = (n_p * n_p * 2 + 2 * n_p * f_max_p * 2               # scratch
            + 2 * row_tile * n_p * 2 + 2 * row_tile * f_in_p * 2  # S / X windows
            + 2 * (row_tile * hid_p[-1] * 4 + row_tile * out_p * 4)  # out windows
            + 2 * sum(int(o.size) * o.dtype.itemsize for o in ops[2:]))  # weights
    need = int(need * 1.25) + (4 << 20)
    budget = _vmem_budget_bytes()
    vmem_limit = int(min(max(need, 32 << 20), budget))
    # TODO(synk): if `need` > `budget`, fall back to a K-blocked hop path that
    # streams S per hop instead of keeping the bf16 S cache resident.

    kernel = functools.partial(_fused_sgc_kernel, schedule=schedule,
                               num_layers=num_layers, row_tile=row_tile)

    emb_padded, out_padded = pl.pallas_call(
        kernel,
        out_shape=(
            jax.ShapeDtypeStruct((n_p, hid_p[-1]), jnp.float32),
            jax.ShapeDtypeStruct((n_p, out_p), jnp.float32),
        ),
        grid_spec=pltpu.PrefetchScalarGridSpec(
            num_scalar_prefetch=0,
            grid=(num_phases, num_row_tiles),
            in_specs=in_specs,
            out_specs=out_specs,
            scratch_shapes=scratch_shapes),
        compiler_params=pltpu.CompilerParams(
            # Row axis is NOT "parallel": later phases read all rows of the
            # previous phase through shared VMEM scratch (see v7x TODO above).
            dimension_semantics=("arbitrary", "arbitrary"),
            vmem_limit_bytes=vmem_limit),
        cost_estimate=pl.CostEstimate(
            flops=int(flops), transcendentals=0, bytes_accessed=int(bytes_accessed)),
    )(*ops)

    embedding = emb_padded[:n, :hidden_last]
    logits = out_padded[:n, :out_dim]
    return embedding, logits


def reference_forward(params, x, edge_index):
    """Plain-JAX f32 reference of SGCExtract.forward (for sanity checking)."""
    s = build_norm_adj(edge_index, x.shape[0])
    for w, b in params["layers"]:
        x = jax.nn.relu(s @ (s @ x) @ w + b)
    embedding = x
    wf, bf = params["fc"]
    return embedding, x @ wf + bf


# ----------------------------------- main ------------------------------------ #

if __name__ == "__main__":
    key = jax.random.PRNGKey(0)

    # small shapes: 16 nodes, in_dim=8, hidden=[64, 32], out_dim=4
    # (NOTE: perf tuning should be done at N >= 2k — these shapes are pure
    #  launch overhead and only exercise correctness.)
    num_nodes, in_dim, out_dim = 16, 8, 4
    hidden_dim = [64, 32]

    key, kx = jax.random.split(key)
    x = jax.random.normal(kx, (num_nodes, in_dim), jnp.float32)

    # deterministic ring graph (bidirectional edges), edge_index shape (2, E)
    src = jnp.arange(num_nodes, dtype=jnp.int32)
    dst = (src + 1) % num_nodes
    edge_index = jnp.stack(
        [jnp.concatenate([src, dst]), jnp.concatenate([dst, src])], axis=0
    )

    params = init_params(key, in_dim, out_dim, hidden_dim)

    embedding, logits = sgc_extract_forward(params, x, edge_index)
    jax.block_until_ready((embedding, logits))

    assert embedding.shape == (num_nodes, hidden_dim[-1])
    assert logits.shape == (num_nodes, out_dim)

    # loose check vs. f32 reference (kernel runs bf16 MXU inputs w/ f32 accum)
    emb_expected, out_expected = reference_forward(params, x, edge_index)
    assert float(jnp.max(jnp.abs(embedding - emb_expected))) < 0.1
    assert float(jnp.max(jnp.abs(logits - out_expected))) < 0.1

    print("KERNEL_OK")
</pallas_src>

<mosaic_0001>
module attributes {stable_mosaic.version = 11 : i64} {
  func.func @_fused_sgc_kernel(%arg0: i32, %arg1: i32, %arg2: memref<128x128xbf16, #tpu.memory_space<vmem>>, %arg3: memref<128x128xbf16, #tpu.memory_space<vmem>>, %arg4: memref<128x128xbf16, #tpu.memory_space<vmem>>, %arg5: memref<1x128xf32, #tpu.memory_space<vmem>>, %arg6: memref<128x128xbf16, #tpu.memory_space<vmem>>, %arg7: memref<1x128xf32, #tpu.memory_space<vmem>>, %arg8: memref<128x128xbf16, #tpu.memory_space<vmem>>, %arg9: memref<1x128xf32, #tpu.memory_space<vmem>>, %arg10: memref<128x128xf32, #tpu.memory_space<vmem>>, %arg11: memref<128x128xf32, #tpu.memory_space<vmem>>, %arg12: memref<128x128xbf16, #tpu.memory_space<vmem>>, %arg13: memref<128x128xbf16, #tpu.memory_space<vmem>>, %arg14: memref<128x128xbf16, #tpu.memory_space<vmem>>) attributes {dimension_semantics = [#tpu.dimension_semantics<arbitrary>, #tpu.dimension_semantics<arbitrary>], iteration_bounds = array<i64: 6, 1>, scalar_prefetch = 0 : i64, scratch_operands = 3 : i64, tpu.core_type = #tpu.core_type<tc>, window_params = [{transform_indices = @transform_0, window_bounds = array<i64: 128, 128>}, {transform_indices = @transform_1, window_bounds = array<i64: 128, 128>}, {pipeline_mode = #tpu.pipeline_mode<synchronous>, transform_indices = @transform_2, window_bounds = array<i64: 128, 128>}, {pipeline_mode = #tpu.pipeline_mode<synchronous>, transform_indices = @transform_3, window_bounds = array<i64: 1, 128>}, {pipeline_mode = #tpu.pipeline_mode<synchronous>, transform_indices = @transform_4, window_bounds = array<i64: 128, 128>}, {pipeline_mode = #tpu.pipeline_mode<synchronous>, transform_indices = @transform_5, window_bounds = array<i64: 1, 128>}, {pipeline_mode = #tpu.pipeline_mode<synchronous>, transform_indices = @transform_6, window_bounds = array<i64: 128, 128>}, {pipeline_mode = #tpu.pipeline_mode<synchronous>, transform_indices = @transform_7, window_bounds = array<i64: 1, 128>}, {transform_indices = @transform_8, window_bounds = array<i64: 128, 128>}, {transform_indices = @transform_9, window_bounds = array<i64: 128, 128>}]} {
    %c128_i32 = arith.constant 128 : i32
    %0 = arith.muli %arg1, %c128_i32 : i32
    %1 = tpu.assume_multiple %0, 128 : i32
    %c0_i32 = arith.constant 0 : i32
    %2 = arith.cmpi eq, %arg0, %c0_i32 : i32
    %3 = arith.extui %2 : i1 to i32
    %c0_i32_0 = arith.constant 0 : i32
    %4 = arith.cmpi ne, %3, %c0_i32_0 : i32
    scf.if %4 {
      %c0 = arith.constant 0 : index
      %c0_6 = arith.constant 0 : index
      %20 = vector.load %arg3[%c0, %c0_6] : memref<128x128xbf16, #tpu.memory_space<vmem>>, vector<128x128xbf16>
      %c0_7 = arith.constant 0 : index
      %c0_8 = arith.constant 0 : index
      %21 = vector.load %arg4[%c0_7, %c0_8] : memref<128x128xbf16, #tpu.memory_space<vmem>>, vector<128x128xbf16>
      %cst = arith.constant dense<0.000000e+00> : vector<128x128xf32>
      %22 = tpu.matmul %20, %21, %cst {dimension_numbers = #tpu.dot_dimension_numbers<[1], [0], [0], [1], [0, 0, 1, 1], [], []>} : vector<128x128xbf16>, vector<128x128xbf16>, vector<128x128xf32> -> vector<128x128xf32>
      %23 = arith.truncf %22 : vector<128x128xf32> to vector<128x128xbf16>
      %24 = arith.index_cast %1 : i32 to index
      %c0_9 = arith.constant 0 : index
      %25 = vector.load %arg13[%24, %c0_9] : memref<128x128xbf16, #tpu.memory_space<vmem>>, vector<128x128xbf16>
      tpu.vector_store %arg13[%24, %c0_9], %23 {strides = array<i32>} : memref<128x128xbf16, #tpu.memory_space<vmem>>, vector<128x128xbf16>,
    } else {
    }
    %c1_i32 = arith.constant 1 : i32
    %5 = arith.cmpi eq, %arg0, %c1_i32 : i32
    %6 = arith.extui %5 : i1 to i32
    %c0_i32_1 = arith.constant 0 : i32
    %7 = arith.cmpi ne, %6, %c0_i32_1 : i32
    scf.if %7 {
      %c0 = arith.constant 0 : index
      %c0_6 = arith.constant 0 : index
      %20 = vector.load %arg2[%c0, %c0_6] : memref<128x128xbf16, #tpu.memory_space<vmem>>, vector<128x128xbf16>
      %21 = arith.index_cast %1 : i32 to index
      %c0_7 = arith.constant 0 : index
      %22 = vector.load %arg12[%21, %c0_7] : memref<128x128xbf16, #tpu.memory_space<vmem>>, vector<128x128xbf16>
      tpu.vector_store %arg12[%21, %c0_7], %20 {strides = array<i32>} : memref<128x128xbf16, #tpu.memory_space<vmem>>, vector<128x128xbf16>,
      %c0_8 = arith.constant 0 : index
      %c0_9 = arith.constant 0 : index
      %23 = vector.load %arg13[%c0_8, %c0_9] : memref<128x128xbf16, #tpu.memory_space<vmem>>, vector<128x128xbf16>
      %cst = arith.constant dense<0.000000e+00> : vector<128x128xf32>
      %24 = tpu.matmul %20, %23, %cst {dimension_numbers = #tpu.dot_dimension_numbers<[1], [0], [0], [1], [0, 0, 1, 1], [], []>} : vector<128x128xbf16>, vector<128x128xbf16>, vector<128x128xf32> -> vector<128x128xf32>
      %25 = arith.truncf %24 : vector<128x128xf32> to vector<128x128xbf16>
      %26 = arith.index_cast %1 : i32 to index
      %c0_10 = arith.constant 0 : index
      %27 = vector.load %arg14[%26, %c0_10] : memref<128x128xbf16, #tpu.memory_space<vmem>>, vector<128x128xbf16>
      tpu.vector_store %arg14[%26, %c0_10], %25 {strides = array<i32>} : memref<128x128xbf16, #tpu.memory_space<vmem>>, vector<128x128xbf16>,
    } else {
    }
    %c2_i32 = arith.constant 2 : i32
    %8 = arith.cmpi eq, %arg0, %c2_i32 : i32
    %9 = arith.extui %8 : i1 to i32
    %c0_i32_2 = arith.constant 0 : i32
    %10 = arith.cmpi ne, %9, %c0_i32_2 : i32
    scf.if %10 {
      %20 = arith.index_cast %1 : i32 to index
      %c0 = arith.constant 0 : index
      %21 = vector.load %arg12[%20, %c0] : memref<128x128xbf16, #tpu.memory_space<vmem>>, vector<128x128xbf16>
      %c0_6 = arith.constant 0 : index
      %c0_7 = arith.constant 0 : index
      %22 = vector.load %arg14[%c0_6, %c0_7] : memref<128x128xbf16, #tpu.memory_space<vmem>>, vector<128x128xbf16>
      %cst = arith.constant dense<0.000000e+00> : vector<128x128xf32>
      %23 = tpu.matmul %21, %22, %cst {dimension_numbers = #tpu.dot_dimension_numbers<[1], [0], [0], [1], [0, 0, 1, 1], [], []>} : vector<128x128xbf16>, vector<128x128xbf16>, vector<128x128xf32> -> vector<128x128xf32>
      %c0_8 = arith.constant 0 : index
      %c0_9 = arith.constant 0 : index
      %24 = vector.load %arg5[%c0_8, %c0_9] : memref<1x128xf32, #tpu.memory_space<vmem>>, vector<1x128xf32>
      %25 = vector.broadcast %24 : vector<1x128xf32> to vector<128x128xf32>
      %26 = arith.addf %23, %25 : vector<128x128xf32>
      %cst_10 = arith.constant 0.000000e+00 : f32
      %27 = vector.broadcast %cst_10 : f32 to vector<128x128xf32>
      %28 = arith.maximumf %26, %27 : vector<128x128xf32>
      %29 = arith.truncf %28 : vector<128x128xf32> to vector<128x128xbf16>
      %30 = arith.index_cast %1 : i32 to index
      %c0_11 = arith.constant 0 : index
      %31 = vector.load %arg13[%30, %c0_11] : memref<128x128xbf16, #tpu.memory_space<vmem>>, vector<128x128xbf16>
      tpu.vector_store %arg13[%30, %c0_11], %29 {strides = array<i32>} : memref<128x128xbf16, #tpu.memory_space<vmem>>, vector<128x128xbf16>,
    } else {
    }
    %c3_i32 = arith.constant 3 : i32
    %11 = arith.cmpi eq, %arg0, %c3_i32 : i32
    %12 = arith.extui %11 : i1 to i32
    %c0_i32_3 = arith.constant 0 : i32
    %13 = arith.cmpi ne, %12, %c0_i32_3 : i32
    scf.if %13 {
      %20 = arith.index_cast %1 : i32 to index
      %c0 = arith.constant 0 : index
      %21 = vector.load %arg13[%20, %c0] : memref<128x128xbf16, #tpu.memory_space<vmem>>, vector<128x128xbf16>
      %c0_6 = arith.constant 0 : index
      %c0_7 = arith.constant 0 : index
      %22 = vector.load %arg6[%c0_6, %c0_7] : memref<128x128xbf16, #tpu.memory_space<vmem>>, vector<128x128xbf16>
      %cst = arith.constant dense<0.000000e+00> : vector<128x128xf32>
      %23 = tpu.matmul %21, %22, %cst {dimension_numbers = #tpu.dot_dimension_numbers<[1], [0], [0], [1], [0, 0, 1, 1], [], []>} : vector<128x128xbf16>, vector<128x128xbf16>, vector<128x128xf32> -> vector<128x128xf32>
      %24 = arith.truncf %23 : vector<128x128xf32> to vector<128x128xbf16>
      %25 = arith.index_cast %1 : i32 to index
      %c0_8 = arith.constant 0 : index
      %26 = vector.load %arg14[%25, %c0_8] : memref<128x128xbf16, #tpu.memory_space<vmem>>, vector<128x128xbf16>
      tpu.vector_store %arg14[%25, %c0_8], %24 {strides = array<i32>} : memref<128x128xbf16, #tpu.memory_space<vmem>>, vector<128x128xbf16>,
    } else {
    }
    %c4_i32 = arith.constant 4 : i32
    %14 = arith.cmpi eq, %arg0, %c4_i32 : i32
    %15 = arith.extui %14 : i1 to i32
    %c0_i32_4 = arith.constant 0 : i32
    %16 = arith.cmpi ne, %15, %c0_i32_4 : i32
    scf.if %16 {
      %20 = arith.index_cast %1 : i32 to index
      %c0 = arith.constant 0 : index
      %21 = vector.load %arg12[%20, %c0] : memref<128x128xbf16, #tpu.memory_space<vmem>>, vector<128x128xbf16>
      %c0_6 = arith.constant 0 : index
      %c0_7 = arith.constant 0 : index
      %22 = vector.load %arg14[%c0_6, %c0_7] : memref<128x128xbf16, #tpu.memory_space<vmem>>, vector<128x128xbf16>
      %cst = arith.constant dense<0.000000e+00> : vector<128x128xf32>
      %23 = tpu.matmul %21, %22, %cst {dimension_numbers = #tpu.dot_dimension_numbers<[1], [0], [0], [1], [0, 0, 1, 1], [], []>} : vector<128x128xbf16>, vector<128x128xbf16>, vector<128x128xf32> -> vector<128x128xf32>
      %24 = arith.truncf %23 : vector<128x128xf32> to vector<128x128xbf16>
      %25 = arith.index_cast %1 : i32 to index
      %c0_8 = arith.constant 0 : index
      %26 = vector.load %arg13[%25, %c0_8] : memref<128x128xbf16, #tpu.memory_space<vmem>>, vector<128x128xbf16>
      tpu.vector_store %arg13[%25, %c0_8], %24 {strides = array<i32>} : memref<128x128xbf16, #tpu.memory_space<vmem>>, vector<128x128xbf16>,
    } else {
    }
    %c5_i32 = arith.constant 5 : i32
    %17 = arith.cmpi eq, %arg0, %c5_i32 : i32
    %18 = arith.extui %17 : i1 to i32
    %c0_i32_5 = arith.constant 0 : i32
    %19 = arith.cmpi ne, %18, %c0_i32_5 : i32
    scf.if %19 {
      %20 = arith.index_cast %1 : i32 to index
      %c0 = arith.constant 0 : index
      %21 = vector.load %arg12[%20, %c0] : memref<128x128xbf16, #tpu.memory_space<vmem>>, vector<128x128xbf16>
      %c0_6 = arith.constant 0 : index
      %c0_7 = arith.constant 0 : index
      %22 = vector.load %arg13[%c0_6, %c0_7] : memref<128x128xbf16, #tpu.memory_space<vmem>>, vector<128x128xbf16>
      %cst = arith.constant dense<0.000000e+00> : vector<128x128xf32>
      %23 = tpu.matmul %21, %22, %cst {dimension_numbers = #tpu.dot_dimension_numbers<[1], [0], [0], [1], [0, 0, 1, 1], [], []>} : vector<128x128xbf16>, vector<128x128xbf16>, vector<128x128xf32> -> vector<128x128xf32>
      %c0_8 = arith.constant 0 : index
      %c0_9 = arith.constant 0 : index
      %24 = vector.load %arg7[%c0_8, %c0_9] : memref<1x128xf32, #tpu.memory_space<vmem>>, vector<1x128xf32>
      %25 = vector.broadcast %24 : vector<1x128xf32> to vector<128x128xf32>
      %26 = arith.addf %23, %25 : vector<128x128xf32>
      %cst_10 = arith.constant 0.000000e+00 : f32
      %27 = vector.broadcast %cst_10 : f32 to vector<128x128xf32>
      %28 = arith.maximumf %26, %27 : vector<128x128xf32>
      %c0_11 = arith.constant 0 : index
      %c0_12 = arith.constant 0 : index
      %29 = vector.load %arg10[%c0_11, %c0_12] : memref<128x128xf32, #tpu.memory_space<vmem>>, vector<128x128xf32>
      tpu.vector_store %arg10[%c0_11, %c0_12], %28 {strides = array<i32>} : memref<128x128xf32, #tpu.memory_space<vmem>>, vector<128x128xf32>,
      %30 = arith.truncf %28 : vector<128x128xf32> to vector<128x128xbf16>
      %c0_13 = arith.constant 0 : index
      %c0_14 = arith.constant 0 : index
      %31 = vector.load %arg8[%c0_13, %c0_14] : memref<128x128xbf16, #tpu.memory_space<vmem>>, vector<128x128xbf16>
      %cst_15 = arith.constant dense<0.000000e+00> : vector<128x128xf32>
      %32 = tpu.matmul %30, %31, %cst_15 {dimension_numbers = #tpu.dot_dimension_numbers<[1], [0], [0], [1], [0, 0, 1, 1], [], []>} : vector<128x128xbf16>, vector<128x128xbf16>, vector<128x128xf32> -> vector<128x128xf32>
      %c0_16 = arith.constant 0 : index
      %c0_17 = arith.constant 0 : index
      %33 = vector.load %arg9[%c0_16, %c0_17] : memref<1x128xf32, #tpu.memory_space<vmem>>, vector<1x128xf32>
      %34 = vector.broadcast %33 : vector<1x128xf32> to vector<128x128xf32>
      %35 = arith.addf %32, %34 : vector<128x128xf32>
      %c0_18 = arith.constant 0 : index
      %c0_19 = arith.constant 0 : index
      %36 = vector.load %arg11[%c0_18, %c0_19] : memref<128x128xf32, #tpu.memory_space<vmem>>, vector<128x128xf32>
      tpu.vector_store %arg11[%c0_18, %c0_19], %35 {strides = array<i32>} : memref<128x128xf32, #tpu.memory_space<vmem>>, vector<128x128xf32>,
    } else {
    }
    return
  }
  func.func @transform_0(%arg0: i32, %arg1: i32) -> (i32, i32) {
    %c1_i32 = arith.constant 1 : i32
    %0 = arith.cmpi eq, %arg0, %c1_i32 : i32
    %c1_i32_0 = arith.constant 1 : i32
    %1 = arith.cmpi slt, %arg0, %c1_i32_0 : i32
    %c0_i32 = arith.constant 0 : i32
    %c0_i32_1 = arith.constant 0 : i32
    %2 = arith.select %1, %c0_i32, %c0_i32_1 : i32
    %3 = arith.select %0, %arg1, %2 : i32
    %c0_i32_2 = arith.constant 0 : i32
    %c0_i32_3 = arith.constant 0 : i32
    return %3, %c0_i32_2 : i32, i32
  }
  func.func @transform_1(%arg0: i32, %arg1: i32) -> (i32, i32) {
    %c0_i32 = arith.constant 0 : i32
    %0 = arith.cmpi eq, %arg0, %c0_i32 : i32
    %c0_i32_0 = arith.constant 0 : i32
    %1 = arith.select %0, %arg1, %c0_i32_0 : i32
    %c0_i32_1 = arith.constant 0 : i32
    %c0_i32_2 = arith.constant 0 : i32
    return %1, %c0_i32_1 : i32, i32
  }
  func.func @transform_2(%arg0: i32, %arg1: i32) -> (i32, i32) {
    %c0_i32 = arith.constant 0 : i32
    %c0_i32_0 = arith.constant 0 : i32
    %c0_i32_1 = arith.constant 0 : i32
    return %c0_i32, %c0_i32_0 : i32, i32
  }
  func.func @transform_3(%arg0: i32, %arg1: i32) -> (i32, i32) {
    %c0_i32 = arith.constant 0 : i32
    %c0_i32_0 = arith.constant 0 : i32
    %c0_i32_1 = arith.constant 0 : i32
    return %c0_i32, %c0_i32_0 : i32, i32
  }
  func.func @transform_4(%arg0: i32, %arg1: i32) -> (i32, i32) {
    %c0_i32 = arith.constant 0 : i32
    %c0_i32_0 = arith.constant 0 : i32
    %c0_i32_1 = arith.constant 0 : i32
    return %c0_i32, %c0_i32_0 : i32, i32
  }
  func.func @transform_5(%arg0: i32, %arg1: i32) -> (i32, i32) {
    %c0_i32 = arith.constant 0 : i32
    %c0_i32_0 = arith.constant 0 : i32
    %c0_i32_1 = arith.constant 0 : i32
    return %c0_i32, %c0_i32_0 : i32, i32
  }
  func.func @transform_6(%arg0: i32, %arg1: i32) -> (i32, i32) {
    %c0_i32 = arith.constant 0 : i32
    %c0_i32_0 = arith.constant 0 : i32
    %c0_i32_1 = arith.constant 0 : i32
    return %c0_i32, %c0_i32_0 : i32, i32
  }
  func.func @transform_7(%arg0: i32, %arg1: i32) -> (i32, i32) {
    %c0_i32 = arith.constant 0 : i32
    %c0_i32_0 = arith.constant 0 : i32
    %c0_i32_1 = arith.constant 0 : i32
    return %c0_i32, %c0_i32_0 : i32, i32
  }
  func.func @transform_8(%arg0: i32, %arg1: i32) -> (i32, i32) {
    %c5_i32 = arith.constant 5 : i32
    %0 = arith.cmpi eq, %arg0, %c5_i32 : i32
    %c0_i32 = arith.constant 0 : i32
    %1 = arith.select %0, %arg1, %c0_i32 : i32
    %c0_i32_0 = arith.constant 0 : i32
    %c0_i32_1 = arith.constant 0 : i32
    return %1, %c0_i32_0 : i32, i32
  }
  func.func @transform_9(%arg0: i32, %arg1: i32) -> (i32, i32) {
    %c5_i32 = arith.constant 5 : i32
    %0 = arith.cmpi eq, %arg0, %c5_i32 : i32
    %c0_i32 = arith.constant 0 : i32
    %1 = arith.select %0, %arg1, %c0_i32 : i32
    %c0_i32_0 = arith.constant 0 : i32
    %c0_i32_1 = arith.constant 0 : i32
    return %1, %c0_i32_0 : i32, i32
  }
}

</mosaic_0001>

<bundles_post_ra>
// kernel: tpu_custom_call.1
= control target key start
LH: loop header
LB: loop body
LE: loop exit
PB: predicated region body
PF: predicated region fallthrough
CT: control target
= control target key end

     0   :  { %15 = vsyncpa [#allocation6], 0  ;;  %s3708_s0 = inlined_call_operand.hbm [shape: bf16[128,128], index: 0, kind: input, shape index: {}]   ;;  %s3709_s1 = inlined_call_operand.hbm [shape: bf16[128,128], index: 1, kind: input, shape index: {}]   ;;  %s3710_s2 = inlined_call_operand.hbm [shape: bf16[128,128], index: 2, kind: input, shape index: {}]   ;;  %s3711_s3 = inlined_call_operand.vmem [shape: f32[1,128], index: 3, kind: input, shape index: {}]   ;;  %s3712_s4 = inlined_call_operand.hbm [shape: bf16[128,128], index: 4, kind: input, shape index: {}]   ;;  %s3713_s5 = inlined_call_operand.vmem [shape: f32[1,128], index: 5, kind: input, shape index: {}]   ;;  %s3714_s6 = inlined_call_operand.hbm [shape: bf16[128,128], index: 6, kind: input, shape index: {}]   ;;  %s3715_s7 = inlined_call_operand.vmem [shape: f32[1,128], index: 7, kind: input, shape index: {}]   ;;  %s3716_s8 = inlined_call_operand.hbm [shape: f32[128,128], index: 8, kind: output, shape index: {0}]   ;;  %s3717_s9 = inlined_call_operand.hbm [shape: f32[128,128], index: 9, kind: output, shape index: {1}]  }
   0x1   :  { %17 = vsyncpa [#allocation6 + $0x1], 0 }
   0x2   :  { %18 = vsyncpa [#allocation9], 0 }
   0x3   :  { %20 = vsyncpa [#allocation9 + $0x1], 0 }
   0x4   :  { %21 = vsyncpa [#allocation12], 0 }
   0x5   :  { %22 = vsyncpa [#allocation7], 0 }
   0x6   :  { %24 = vsyncpa [#allocation7 + $0x1], 0 }
   0x7   :  { %25 = vsyncpa [#allocation16], 0 }
   0x8   :  { %27 = vsyncpa [#allocation16 + $0x1], 0  ;;  %s3557_s30 = smov 0   ;;  %s3559_s10 = smov 0  }
   0x9   :  { %s3561_s11 = smov 0  }
   0xa LB: > { %s3573_s12 = sadd.s32 4294967295, %s3494_s11   ;;  %s2219_s13 = sadd.s32 4294967294, %s3494_s11   ;;  %s3494_s11 = sphi %s3561_s11, %s33_s11   ;;  %s3490_s10 = sphi %s3559_s10, %s3721_s10   ;;  %s3486_s30 = sphi %s3557_s30, %s3720_s30  }
   0xb   : > { %s45_s14 = sadd.s32 1, %s3490_s10  ;;  %p2220_p0 = scmp.ge.s32.totalorder %s3494_s11, 1 }
   0xc   : > { %p47_p1 = scmp.ge.s32.totalorder %s45_s14, 6  ;;  %p296_p2 = scmp.lt.s32.totalorder %s3494_s11, 7 }
   0xd   : > { %p3188_p3 = scmp.eq.s32.totalorder %s3573_s12, 0  ;;  %s307_s18 = sshll.u32 %s3710_s2, 4  ;;  %s308_s18 = int_to_ptr.hbm [resolvable:$true] %s307_s18 }
   0xe   : > { %s3723_s14 = smov (%p47_p1, %s45_s14), 0  ;;  %p3582_p4 = pnand %p2220_p0, %p296_p2 }
   0xf   : > { %s3496_s19 = smov [#allocation10]   ;;  %s324_s24 = sshll.u32 %s3712_s4, 4  ;;  %s325_s24 = int_to_ptr.hbm [resolvable:$true] %s324_s24 }
  0x10   : > { %p3164_p5 = pneg %p3582_p4  ;;  %s309_s20 = sshll.u32 %s3496_s19, 4  ;;  %s310_s20 = int_to_ptr.vmem [resolvable:$true] %s309_s20 }
  0x11   : > { %s3497_s25 = smov 64   ;;  %s3498_s26 = smov 4  }
  0x12   : > { %p3593_p6 = pnand %p3188_p3, %p3164_p5  ;;  %s3499_s27 = smov [#allocation11]  }
  0x13   : > { %s326_s28 = sshll.u32 %s3499_s27, 4  ;;  %s341_s17 = sshll.u32 %s3714_s6, 4  ;;  %s327_s28 = int_to_ptr.vmem [resolvable:$true] %s326_s28  ;;  %s342_s17 = int_to_ptr.hbm [resolvable:$true] %s341_s17 }
  0x14   : > { %3167 = dma.hbm_to_vmem [thread:$0]  (!%p3593_p6), %s308_s18, 1024, %s310_s20, [#allocation9], %s3497_s25, %s3497_s25, %s3498_s26  }
  0x15   : > { %3170 = dma.hbm_to_vmem [thread:$0]  (!%p3593_p6), %s325_s24, 1024, %s327_s28, [#allocation12], %s3497_s25, %s3497_s25, %s3498_s26  }
  0x16   : > { %p3191_p7 = scmp.lt.s32.totalorder %s3494_s11, 6  ;;  %s3500_s19 = smov [#allocation13]  }
  0x17   : > { %s343_s22 = sshll.u32 %s3500_s19, 4  ;;  %p3192_p8 = scmp.eq.s32.totalorder %s3494_s11, 0  ;;  %s344_s22 = int_to_ptr.vmem [resolvable:$true] %s343_s22 }
  0x18   : > { %s372_s23 = sshll.u32 %s3708_s0, 4  ;;  %s3501_s27 = smov [#allocation5]   ;;  %s373_s23 = int_to_ptr.hbm [resolvable:$true] %s372_s23 }
  0x19   : > { %3173 = dma.hbm_to_vmem [thread:$0]  (!%p3593_p6), %s342_s17, 1024, %s344_s22, [#allocation12], %s3497_s25, %s3497_s25, %s3498_s26  }
  0x1a   : > { %s374_s29 = sshll.u32 %s3501_s27, 4  ;;  %p3175_p9 = pnand %p3192_p8, %p3191_p7  ;;  %s375_s29 = int_to_ptr.vmem [resolvable:$true] %s374_s29 }
  0x1b   : > { %s384_s24 = sand.u32 1, %s3494_s11   ;;  %s396_s19 = sshll.u32 %s3709_s1, 4  ;;  %s397_s19 = int_to_ptr.hbm [resolvable:$true] %s396_s19 }
  0x1c   : > { %3177 = dma.hbm_to_vmem [thread:$0]  (!%p3175_p9), %s373_s23, 1024, %s375_s29, [#allocation6], %s3497_s25, %s3497_s25, %s3498_s26  }
  0x1d   : > { %s3502_s21 = smov [#allocation8]   ;;  %s385_s20 = scalar_lea.sflag [#allocation9], %s384_s24 }
  0x1e   : > { %s398_s18 = sshll.u32 %s3502_s21, 4  ;;  %410 = sbr.rel (%p3582_p4) target bundleno = 1432 (0x598), region = 52  ;;  %s399_s18 = int_to_ptr.vmem [resolvable:$true] %s398_s18 }
  0x1f   : > { %3180 = dma.hbm_to_vmem [thread:$0]  (!%p3175_p9), %s397_s19, 1024, %s399_s18, %s385_s20, %s3497_s25, %s3497_s25, %s3498_s26  }
  0x23   : > { %3461 = dma.done.wait (%p3188_p3), [#allocation6], 1024  }
  0x24   : > { %3463 = vsyncadd (%p3188_p3), [#allocation6], 4294966272  ;;  %s422_s17 = sand.u32 1, %s3573_s12  }
  0x25   : > { %s423_s22 = scalar_lea.sflag [#allocation9], %s422_s17 }
  0x26   : > { %3465 = dma.done.wait (%p3188_p3), %s423_s22, 1024  }
  0x27   : > { %3467 = vsyncadd (%p3188_p3), %s423_s22, 4294966272 }
  0x28   : > { %3469 = dma.done.wait (%p3188_p3), [#allocation9], 1024  }
  0x29   : > { %3471 = vsyncadd (%p3188_p3), [#allocation9], 4294966272 }
  0x2a   : > { %3473 = dma.done.wait (%p3188_p3), [#allocation12], 2048  }
  0x2b   : > { %3475 = vsyncadd (%p3188_p3), [#allocation12], 4294965248  ;;  %p2233_p10 = scmp.ne.s32.totalorder %s3486_s30, 0 }
  0x2d   : > { %503 = sbr.rel (%p2233_p10) target bundleno = 243 (0xf3), region = 76 }
  0x32   : > { %v2676_v0 = vld [vmem:[#allocation10 + $0x38] sm:$0xff]  ;;  %v2675_v1 = vld [vmem:[#allocation10 + $0x30] sm:$0xff]  ;;  %v2674_v2 = vld [vmem:[#allocation10 + $0x28] sm:$0xff] }
  0x33   : > { %632 = vmatpush.bf16.msra.mxu0 %v2676_v0  ;;  %3000 = vmatpush.bf16.msra.mxu1 %v2676_v0  ;;  %v2673_v3 = vld [vmem:[#allocation10 + $0x20] sm:$0xff]  ;;  %v2672_v4 = vld [vmem:[#allocation10 + $0x18] sm:$0xff]  ;;  %v2671_v5 = vld [vmem:[#allocation10 + $0x10] sm:$0xff] }
  0x34   : > { %3001 = vmatpush.bf16.msra.mxu2 %v2676_v0  ;;  %3002 = vmatpush.bf16.msra.mxu3 %v2676_v0  ;;  %v2670_v6 = vld [vmem:[#allocation10 + $0x8] sm:$0xff]  ;;  %v2669_v7 = vld [vmem:[#allocation10] sm:$0xff]  ;;  %v2663_v9 = vld [vmem:[#allocation8 + $0x10] sm:$0xff] }
  0x35   : > { %v2661_v8 = vld [vmem:[#allocation8] sm:$0xff]  ;;  %v2667_v11 = vld [vmem:[#allocation8 + $0x30] sm:$0xff]  ;;  %v2662_v12 = vld [vmem:[#allocation8 + $0x8] sm:$0xff] }
  0x36   : > { %v2665_v10 = vld [vmem:[#allocation8 + $0x20] sm:$0xff]  ;;  %v2664_v13 = vld [vmem:[#allocation8 + $0x18] sm:$0xff]  ;;  %v2666_v14 = vld [vmem:[#allocation8 + $0x28] sm:$0xff] }
  0x37   : > { %633 = vmatpush.bf16.msra.mxu0 %v2675_v1  ;;  %3003 = vmatpush.bf16.msra.mxu1 %v2675_v1  ;;  %v2668_v15 = vld [vmem:[#allocation8 + $0x38] sm:$0xff] }
  0x38   : > { %3004 = vmatpush.bf16.msra.mxu2 %v2675_v1  ;;  %3005 = vmatpush.bf16.msra.mxu3 %v2675_v1 }
  0x3b   : > { %634 = vmatpush.bf16.msra.mxu0 %v2674_v2  ;;  %3006 = vmatpush.bf16.msra.mxu1 %v2674_v2 }
  0x3c   : > { %3007 = vmatpush.bf16.msra.mxu2 %v2674_v2  ;;  %3008 = vmatpush.bf16.msra.mxu3 %v2674_v2 }
  0x3f   : > { %635 = vmatpush.bf16.msra.mxu0 %v2673_v3  ;;  %3009 = vmatpush.bf16.msra.mxu1 %v2673_v3 }
  0x40   : > { %3010 = vmatpush.bf16.msra.mxu2 %v2673_v3  ;;  %3011 = vmatpush.bf16.msra.mxu3 %v2673_v3 }
  0x43   : > { %636 = vmatpush.bf16.msra.mxu0 %v2672_v4  ;;  %3012 = vmatpush.bf16.msra.mxu1 %v2672_v4 }
  0x44   : > { %3013 = vmatpush.bf16.msra.mxu2 %v2672_v4  ;;  %3014 = vmatpush.bf16.msra.mxu3 %v2672_v4 }
  0x47   : > { %637 = vmatpush.bf16.msra.mxu0 %v2671_v5  ;;  %3015 = vmatpush.bf16.msra.mxu1 %v2671_v5 }
  0x48   : > { %3016 = vmatpush.bf16.msra.mxu2 %v2671_v5  ;;  %3017 = vmatpush.bf16.msra.mxu3 %v2671_v5 }
  0x4b   : > { %638 = vmatpush.bf16.msra.mxu0 %v2670_v6  ;;  %3018 = vmatpush.bf16.msra.mxu1 %v2670_v6 }
  0x4c   : > { %3019 = vmatpush.bf16.msra.mxu2 %v2670_v6  ;;  %3020 = vmatpush.bf16.msra.mxu3 %v2670_v6 }
  0x4f   : > { %639 = vmatpush.bf16.msra.mxu0 %v2669_v7  ;;  %3021 = vmatpush.bf16.msra.mxu1 %v2669_v7 }
  0x50   : > { %3022 = vmatpush.bf16.msra.mxu2 %v2669_v7  ;;  %3023 = vmatpush.bf16.msra.mxu3 %v2669_v7 }
  0x52   : > { %640 = vmatmul.bf16.vlgmr.msra.gmra.mxu0 %v2661_v8  ;;  %650 = vmatmul.bf16.vlgmr.msra.gmra.mxu1 %v2663_v9 }
  0x53   : > { %660 = vmatmul.bf16.vlgmr.msra.gmra.mxu2 %v2665_v10  ;;  %670 = vmatmul.bf16.vlgmr.msra.gmra.mxu3 %v2667_v11 }
  0x62   : > { %645 = vmatmul.bf16.gmra.mxu0 %v2662_v12  ;;  %655 = vmatmul.bf16.gmra.mxu1 %v2664_v13 }
  0x63   : > { %665 = vmatmul.bf16.gmra.mxu2 %v2666_v14  ;;  %675 = vmatmul.bf16.gmra.mxu3 %v2668_v15 }
  0xcf   : > { %v641_v16 = vpop.f32.mrf.mxu0  ;;  %v651_v17 = vpop.f32.mrf.mxu1 }
  0xd6   : > { %v661_v18 = vpop.f32.mrf.mxu2  ;;  %v671_v19 = vpop.f32.mrf.mxu3 }
  0xd7   : > { %v643_v20 = vpop.f32.mrf.mxu0  ;;  %v653_v21 = vpop.f32.mrf.mxu1 }
  0xd8   : > { %v2768_v22 = vpack.c.bf16 %v643_v20, %v641_v16  ;;  %v2778_v23 = vpack.c.bf16 %v653_v21, %v651_v17 }
  0xda   : > { %2769 = vst [vmem:[#allocation3 + $0x30] sm:$0xff] %v2768_v22  }
  0xdb   : > { %2966 = vst [vmem:[#allocation3 + $0x18] sm:$0xff] %v2778_v23  }
  0xde   : > { %v663_v24 = vpop.f32.mrf.mxu2  ;;  %v673_v25 = vpop.f32.mrf.mxu3 }
  0xdf   : > { %v2788_v26 = vpack.c.bf16 %v663_v24, %v661_v18  ;;  %v2798_v27 = vpack.c.bf16 %v673_v25, %v671_v19  ;;  %v646_v28 = vpop.f32.mrf.mxu0  ;;  %v656_v29 = vpop.f32.mrf.mxu1 }
  0xe1   : > { %2968 = vst [vmem:[#allocation3 + $0x8] sm:$0xff] %v2788_v26  }
  0xe2   : > { %2970 = vst [vmem:[#allocation3 + $0x28] sm:$0xff] %v2798_v27  }
  0xe6   : > { %v666_v30 = vpop.f32.mrf.mxu2  ;;  %v676_v31 = vpop.f32.mrf.mxu3 }
  0xe7   : > { %v648_v32 = vpop.f32.mrf.mxu0  ;;  %v658_v33 = vpop.f32.mrf.mxu1 }
  0xe8   : > { %v2773_v34 = vpack.c.bf16 %v648_v32, %v646_v28  ;;  %v2783_v35 = vpack.c.bf16 %v658_v33, %v656_v29 }
  0xea   : > { %2965 = vst [vmem:[#allocation3] sm:$0xff] %v2773_v34  }
  0xeb   : > { %2967 = vst [vmem:[#allocation3 + $0x10] sm:$0xff] %v2783_v35  }
  0xee   : > { %v668_v36 = vpop.f32.mrf.mxu2  ;;  %v678_v37 = vpop.f32.mrf.mxu3 }
  0xef   : > { %v2793_v38 = vpack.c.bf16 %v668_v36, %v666_v30  ;;  %v2803_v39 = vpack.c.bf16 %v678_v37, %v676_v31 }
  0xf1   : > { %2969 = vst [vmem:[#allocation3 + $0x20] sm:$0xff] %v2793_v38  }
  0xf2   : > { %2971 = vst [vmem:[#allocation3 + $0x38] sm:$0xff] %v2803_v39  }
  0xf3 PF: > { %p2298_p11 = scmp.ne.s32.totalorder %s3486_s30, 1 }
  0xf5   : > { %720 = sbr.rel (%p2298_p11) target bundleno = 445 (0x1bd), region = 80 }
  0xfa   : > { %v721_v40 = vld [vmem:[#allocation5] sm:$0xff]   ;;  %v723_v41 = vld [vmem:[#allocation5 + $0x8] sm:$0xff]   ;;  %v725_v42 = vld [vmem:[#allocation5 + $0x10] sm:$0xff]  }
  0xfb   : > { %v727_v43 = vld [vmem:[#allocation5 + $0x18] sm:$0xff]   ;;  %741 = vst [vmem:[#allocation2] sm:$0xff] %v721_v40   ;;  %v729_v44 = vld [vmem:[#allocation5 + $0x20] sm:$0xff]   ;;  %v731_v46 = vld [vmem:[#allocation5 + $0x28] sm:$0xff]  }
  0xfc   : > { %743 = vst [vmem:[#allocation2 + $0x8] sm:$0xff] %v723_v41   ;;  %v2692_v45 = vld [vmem:[#allocation3 + $0x38] sm:$0xff]  ;;  %v733_v47 = vld [vmem:[#allocation5 + $0x30] sm:$0xff]   ;;  %v2691_v48 = vld [vmem:[#allocation3 + $0x28] sm:$0xff] }
  0xfd   : > { %745 = vst [vmem:[#allocation2 + $0x10] sm:$0xff] %v725_v42   ;;  %869 = vmatpush.bf16.msra.mxu0 %v2692_v45  ;;  %3024 = vmatpush.bf16.msra.mxu1 %v2692_v45  ;;  %v735_v49 = vld [vmem:[#allocation5 + $0x38] sm:$0xff]   ;;  %v2690_v50 = vld [vmem:[#allocation3 + $0x20] sm:$0xff]  ;;  %v2689_v51 = vld [vmem:[#allocation3 + $0x8] sm:$0xff] }
  0xfe   : > { %747 = vst [vmem:[#allocation2 + $0x18] sm:$0xff] %v727_v43   ;;  %3025 = vmatpush.bf16.msra.mxu2 %v2692_v45  ;;  %3026 = vmatpush.bf16.msra.mxu3 %v2692_v45  ;;  %v2688_v52 = vld [vmem:[#allocation3 + $0x10] sm:$0xff]  ;;  %v2687_v53 = vld [vmem:[#allocation3 + $0x18] sm:$0xff]  ;;  %v2686_v54 = vld [vmem:[#allocation3] sm:$0xff] }
  0xff   : > { %749 = vst [vmem:[#allocation2 + $0x20] sm:$0xff] %v729_v44   ;;  %v2685_v55 = vld [vmem:[#allocation3 + $0x30] sm:$0xff]  ;;  %v2677_v56 = vld [vmem:[#allocation5] sm:$0xff]  ;;  %v2678_v60 = vld [vmem:[#allocation5 + $0x8] sm:$0xff] }
 0x100   : > { %751 = vst [vmem:[#allocation2 + $0x28] sm:$0xff] %v731_v46   ;;  %v2679_v57 = vld [vmem:[#allocation5 + $0x10] sm:$0xff]  ;;  %v2681_v58 = vld [vmem:[#allocation5 + $0x20] sm:$0xff]  ;;  %v2680_v61 = vld [vmem:[#allocation5 + $0x18] sm:$0xff] }
 0x101   : > { %753 = vst [vmem:[#allocation2 + $0x30] sm:$0xff] %v733_v47   ;;  %870 = vmatpush.bf16.msra.mxu0 %v2691_v48  ;;  %3027 = vmatpush.bf16.msra.mxu1 %v2691_v48  ;;  %v2683_v59 = vld [vmem:[#allocation5 + $0x30] sm:$0xff]  ;;  %v2682_v62 = vld [vmem:[#allocation5 + $0x28] sm:$0xff]  ;;  %v2684_v63 = vld [vmem:[#allocation5 + $0x38] sm:$0xff] }
 0x102   : > { %755 = vst [vmem:[#allocation2 + $0x38] sm:$0xff] %v735_v49   ;;  %3028 = vmatpush.bf16.msra.mxu2 %v2691_v48  ;;  %3029 = vmatpush.bf16.msra.mxu3 %v2691_v48 }
 0x105   : > { %871 = vmatpush.bf16.msra.mxu0 %v2690_v50  ;;  %3030 = vmatpush.bf16.msra.mxu1 %v2690_v50 }
 0x106   : > { %3031 = vmatpush.bf16.msra.mxu2 %v2690_v50  ;;  %3032 = vmatpush.bf16.msra.mxu3 %v2690_v50 }
 0x109   : > { %872 = vmatpush.bf16.msra.mxu0 %v2689_v51  ;;  %3033 = vmatpush.bf16.msra.mxu1 %v2689_v51 }
 0x10a   : > { %3034 = vmatpush.bf16.msra.mxu2 %v2689_v51  ;;  %3035 = vmatpush.bf16.msra.mxu3 %v2689_v51 }
 0x10d   : > { %873 = vmatpush.bf16.msra.mxu0 %v2688_v52  ;;  %3036 = vmatpush.bf16.msra.mxu1 %v2688_v52 }
 0x10e   : > { %3037 = vmatpush.bf16.msra.mxu2 %v2688_v52  ;;  %3038 = vmatpush.bf16.msra.mxu3 %v2688_v52 }
 0x111   : > { %874 = vmatpush.bf16.msra.mxu0 %v2687_v53  ;;  %3039 = vmatpush.bf16.msra.mxu1 %v2687_v53 }
 0x112   : > { %3040 = vmatpush.bf16.msra.mxu2 %v2687_v53  ;;  %3041 = vmatpush.bf16.msra.mxu3 %v2687_v53 }
 0x115   : > { %875 = vmatpush.bf16.msra.mxu0 %v2686_v54  ;;  %3042 = vmatpush.bf16.msra.mxu1 %v2686_v54 }
 0x116   : > { %3043 = vmatpush.bf16.msra.mxu2 %v2686_v54  ;;  %3044 = vmatpush.bf16.msra.mxu3 %v2686_v54 }
 0x119   : > { %876 = vmatpush.bf16.msra.mxu0 %v2685_v55  ;;  %3045 = vmatpush.bf16.msra.mxu1 %v2685_v55 }
 0x11a   : > { %3046 = vmatpush.bf16.msra.mxu2 %v2685_v55  ;;  %3047 = vmatpush.bf16.msra.mxu3 %v2685_v55 }
 0x11c   : > { %877 = vmatmul.bf16.vlgmr.msra.gmra.mxu0 %v2677_v56  ;;  %887 = vmatmul.bf16.vlgmr.msra.gmra.mxu1 %v2679_v57 }
 0x11d   : > { %897 = vmatmul.bf16.vlgmr.msra.gmra.mxu2 %v2681_v58  ;;  %907 = vmatmul.bf16.vlgmr.msra.gmra.mxu3 %v2683_v59 }
 0x12c   : > { %882 = vmatmul.bf16.gmra.mxu0 %v2678_v60  ;;  %892 = vmatmul.bf16.gmra.mxu1 %v2680_v61 }
 0x12d   : > { %902 = vmatmul.bf16.gmra.mxu2 %v2682_v62  ;;  %912 = vmatmul.bf16.gmra.mxu3 %v2684_v63 }
 0x199   : > { %v878_v0 = vpop.f32.mrf.mxu0  ;;  %v888_v1 = vpop.f32.mrf.mxu1 }
 0x1a0   : > { %v898_v2 = vpop.f32.mrf.mxu2  ;;  %v908_v3 = vpop.f32.mrf.mxu3 }
 0x1a1   : > { %v880_v4 = vpop.f32.mrf.mxu0  ;;  %v890_v5 = vpop.f32.mrf.mxu1 }
 0x1a2   : > { %v2808_v6 = vpack.c.bf16 %v880_v4, %v878_v0  ;;  %v2818_v7 = vpack.c.bf16 %v890_v5, %v888_v1 }
 0x1a4   : > { %2809 = vst [vmem:[#allocation4] sm:$0xff] %v2808_v6  }
 0x1a5   : > { %2973 = vst [vmem:[#allocation4 + $0x10] sm:$0xff] %v2818_v7  }
 0x1a8   : > { %v900_v8 = vpop.f32.mrf.mxu2  ;;  %v910_v9 = vpop.f32.mrf.mxu3 }
 0x1a9   : > { %v2828_v10 = vpack.c.bf16 %v900_v8, %v898_v2  ;;  %v2838_v11 = vpack.c.bf16 %v910_v9, %v908_v3  ;;  %v883_v12 = vpop.f32.mrf.mxu0  ;;  %v893_v13 = vpop.f32.mrf.mxu1 }
 0x1ab   : > { %2975 = vst [vmem:[#allocation4 + $0x28] sm:$0xff] %v2828_v10  }
 0x1ac   : > { %2977 = vst [vmem:[#allocation4 + $0x30] sm:$0xff] %v2838_v11  }
 0x1b0   : > { %v903_v14 = vpop.f32.mrf.mxu2  ;;  %v913_v15 = vpop.f32.mrf.mxu3 }
 0x1b1   : > { %v885_v16 = vpop.f32.mrf.mxu0  ;;  %v895_v17 = vpop.f32.mrf.mxu1 }
 0x1b2   : > { %v2813_v18 = vpack.c.bf16 %v885_v16, %v883_v12  ;;  %v2823_v19 = vpack.c.bf16 %v895_v17, %v893_v13 }
 0x1b4   : > { %2972 = vst [vmem:[#allocation4 + $0x18] sm:$0xff] %v2813_v18  }
 0x1b5   : > { %2974 = vst [vmem:[#allocation4 + $0x20] sm:$0xff] %v2823_v19  }
 0x1b8   : > { %v905_v20 = vpop.f32.mrf.mxu2  ;;  %v915_v21 = vpop.f32.mrf.mxu3 }
 0x1b9   : > { %v2833_v22 = vpack.c.bf16 %v905_v20, %v903_v14  ;;  %v2843_v23 = vpack.c.bf16 %v915_v21, %v913_v15 }
 0x1bb   : > { %2976 = vst [vmem:[#allocation4 + $0x8] sm:$0xff] %v2833_v22  }
 0x1bc   : > { %2978 = vst [vmem:[#allocation4 + $0x38] sm:$0xff] %v2843_v23  }
 0x1bd PF: > { %p2363_p12 = scmp.ne.s32.totalorder %s3486_s30, 2 }
 0x1bf   : > { %955 = sbr.rel (%p2363_p12) target bundleno = 649 (0x289), region = 84 }
 0x1c4   : > { %v2708_v24 = vld [vmem:[#allocation4 + $0x38] sm:$0xff]  ;;  %v2707_v25 = vld [vmem:[#allocation4 + $0x30] sm:$0xff]  ;;  %v2706_v26 = vld [vmem:[#allocation4 + $0x8] sm:$0xff] }
 0x1c5   : > { %1092 = vmatpush.bf16.msra.mxu0 %v2708_v24  ;;  %3048 = vmatpush.bf16.msra.mxu1 %v2708_v24  ;;  %v2705_v27 = vld [vmem:[#allocation4 + $0x28] sm:$0xff]  ;;  %v2704_v28 = vld [vmem:[#allocation4 + $0x20] sm:$0xff]  ;;  %v2703_v29 = vld [vmem:[#allocation4 + $0x10] sm:$0xff] }
 0x1c6   : > { %3049 = vmatpush.bf16.msra.mxu2 %v2708_v24  ;;  %3050 = vmatpush.bf16.msra.mxu3 %v2708_v24  ;;  %v2702_v30 = vld [vmem:[#allocation4 + $0x18] sm:$0xff]  ;;  %v2701_v31 = vld [vmem:[#allocation4] sm:$0xff]  ;;  %v2695_v33 = vld [vmem:[#allocation2 + $0x10] sm:$0xff] }
 0x1c7   : > { %v2693_v32 = vld [vmem:[#allocation2] sm:$0xff]  ;;  %v2699_v35 = vld [vmem:[#allocation2 + $0x30] sm:$0xff]  ;;  %v2694_v36 = vld [vmem:[#allocation2 + $0x8] sm:$0xff] }
 0x1c8   : > { %v2697_v34 = vld [vmem:[#allocation2 + $0x20] sm:$0xff]  ;;  %v2696_v37 = vld [vmem:[#allocation2 + $0x18] sm:$0xff]  ;;  %v2698_v38 = vld [vmem:[#allocation2 + $0x28] sm:$0xff] }
 0x1c9   : > { %1093 = vmatpush.bf16.msra.mxu0 %v2707_v25  ;;  %3051 = vmatpush.bf16.msra.mxu1 %v2707_v25  ;;  %v2700_v39 = vld [vmem:[#allocation2 + $0x38] sm:$0xff]  ;;  %v3239_v42 = vld [vmem:[%s3711_s3] ss:$0 sm:$0xff] }
 0x1ca   : > { %3052 = vmatpush.bf16.msra.mxu2 %v2707_v25  ;;  %3053 = vmatpush.bf16.msra.mxu3 %v2707_v25 }
 0x1cd   : > { %1094 = vmatpush.bf16.msra.mxu0 %v2706_v26  ;;  %3054 = vmatpush.bf16.msra.mxu1 %v2706_v26 }
 0x1ce   : > { %3055 = vmatpush.bf16.msra.mxu2 %v2706_v26  ;;  %3056 = vmatpush.bf16.msra.mxu3 %v2706_v26 }
 0x1d1   : > { %1095 = vmatpush.bf16.msra.mxu0 %v2705_v27  ;;  %3057 = vmatpush.bf16.msra.mxu1 %v2705_v27 }
 0x1d2   : > { %3058 = vmatpush.bf16.msra.mxu2 %v2705_v27  ;;  %3059 = vmatpush.bf16.msra.mxu3 %v2705_v27 }
 0x1d5   : > { %1096 = vmatpush.bf16.msra.mxu0 %v2704_v28  ;;  %3060 = vmatpush.bf16.msra.mxu1 %v2704_v28 }
 0x1d6   : > { %3061 = vmatpush.bf16.msra.mxu2 %v2704_v28  ;;  %3062 = vmatpush.bf16.msra.mxu3 %v2704_v28 }
 0x1d9   : > { %1097 = vmatpush.bf16.msra.mxu0 %v2703_v29  ;;  %3063 = vmatpush.bf16.msra.mxu1 %v2703_v29 }
 0x1da   : > { %3064 = vmatpush.bf16.msra.mxu2 %v2703_v29  ;;  %3065 = vmatpush.bf16.msra.mxu3 %v2703_v29 }
 0x1dd   : > { %1098 = vmatpush.bf16.msra.mxu0 %v2702_v30  ;;  %3066 = vmatpush.bf16.msra.mxu1 %v2702_v30 }
 0x1de   : > { %3067 = vmatpush.bf16.msra.mxu2 %v2702_v30  ;;  %3068 = vmatpush.bf16.msra.mxu3 %v2702_v30 }
 0x1e1   : > { %1099 = vmatpush.bf16.msra.mxu0 %v2701_v31  ;;  %3069 = vmatpush.bf16.msra.mxu1 %v2701_v31 }
 0x1e2   : > { %3070 = vmatpush.bf16.msra.mxu2 %v2701_v31  ;;  %3071 = vmatpush.bf16.msra.mxu3 %v2701_v31 }
 0x1e4   : > { %1100 = vmatmul.bf16.vlgmr.msra.gmra.mxu0 %v2693_v32  ;;  %1110 = vmatmul.bf16.vlgmr.msra.gmra.mxu1 %v2695_v33 }
 0x1e5   : > { %1120 = vmatmul.bf16.vlgmr.msra.gmra.mxu2 %v2697_v34  ;;  %1130 = vmatmul.bf16.vlgmr.msra.gmra.mxu3 %v2699_v35 }
 0x1f4   : > { %1105 = vmatmul.bf16.gmra.mxu0 %v2694_v36  ;;  %1115 = vmatmul.bf16.gmra.mxu1 %v2696_v37 }
 0x1f5   : > { %1125 = vmatmul.bf16.gmra.mxu2 %v2698_v38  ;;  %1135 = vmatmul.bf16.gmra.mxu3 %v2700_v39 }
 0x261   : > { %v1101_v40 = vpop.f32.mrf.mxu0  ;;  %v1111_v41 = vpop.f32.mrf.mxu1 }
 0x262   : > { %v1102_v43 = vadd.f32 %v3239_v42, %v1101_v40  ;;  %v1112_v44 = vadd.f32 %v3239_v42, %v1111_v41 }
 0x264   : > { %v1141_v51 = vmax.f32 %v1102_v43, 0.0  ;;  %v1145_v52 = vmax.f32 %v1112_v44, 0.0 }
 0x268   : > { %v1121_v45 = vpop.f32.mrf.mxu2  ;;  %v1131_v46 = vpop.f32.mrf.mxu3 }
 0x269   : > { %v1103_v47 = vpop.f32.mrf.mxu0  ;;  %v1113_v48 = vpop.f32.mrf.mxu1  ;;  %v1122_v57 = vadd.f32 %v3239_v42, %v1121_v45  ;;  %v1132_v58 = vadd.f32 %v3239_v42, %v1131_v46 }
 0x26a   : > { %v1104_v49 = vadd.f32 %v3239_v42, %v1103_v47  ;;  %v1114_v50 = vadd.f32 %v3239_v42, %v1113_v48 }
 0x26b   : > { %v1149_v1 = vmax.f32 %v1122_v57, 0.0  ;;  %v1153_v2 = vmax.f32 %v1132_v58, 0.0 }
 0x26c   : > { %v1142_v53 = vmax.f32 %v1104_v49, 0.0  ;;  %v1146_v54 = vmax.f32 %v1114_v50, 0.0 }
 0x26e   : > { %v2848_v55 = vpack.c.bf16 %v1142_v53, %v1141_v51  ;;  %v2858_v56 = vpack.c.bf16 %v1146_v54, %v1145_v52 }
 0x270   : > { %2849 = vst [vmem:[#allocation3 + $0x30] sm:$0xff] %v2848_v55   ;;  %v1123_v59 = vpop.f32.mrf.mxu2  ;;  %v1133_v60 = vpop.f32.mrf.mxu3 }
 0x271   : > { %2980 = vst [vmem:[#allocation3 + $0x18] sm:$0xff] %v2858_v56   ;;  %v1124_v61 = vadd.f32 %v3239_v42, %v1123_v59  ;;  %v1134_v62 = vadd.f32 %v3239_v42, %v1133_v60  ;;  %v1106_v63 = vpop.f32.mrf.mxu0  ;;  %v1116_v0 = vpop.f32.mrf.mxu1 }
 0x272   : > { %v1107_v7 = vadd.f32 %v3239_v42, %v1106_v63  ;;  %v1117_v8 = vadd.f32 %v3239_v42, %v1116_v0 }
 0x273   : > { %v1150_v3 = vmax.f32 %v1124_v61, 0.0  ;;  %v1154_v4 = vmax.f32 %v1134_v62, 0.0 }
 0x274   : > { %v1143_v15 = vmax.f32 %v1107_v7, 0.0  ;;  %v1147_v16 = vmax.f32 %v1117_v8, 0.0 }
 0x275   : > { %v2868_v5 = vpack.c.bf16 %v1150_v3, %v1149_v1  ;;  %v2878_v6 = vpack.c.bf16 %v1154_v4, %v1153_v2 }
 0x277   : > { %2982 = vst [vmem:[#allocation3 + $0x8] sm:$0xff] %v2868_v5  }
 0x278   : > { %2984 = vst [vmem:[#allocation3 + $0x28] sm:$0xff] %v2878_v6   ;;  %v1126_v9 = vpop.f32.mrf.mxu2  ;;  %v1136_v10 = vpop.f32.mrf.mxu3 }
 0x279   : > { %v1108_v11 = vpop.f32.mrf.mxu0  ;;  %v1118_v12 = vpop.f32.mrf.mxu1  ;;  %v1127_v21 = vadd.f32 %v3239_v42, %v1126_v9  ;;  %v1137_v22 = vadd.f32 %v3239_v42, %v1136_v10 }
 0x27a   : > { %v1109_v13 = vadd.f32 %v3239_v42, %v1108_v11  ;;  %v1119_v14 = vadd.f32 %v3239_v42, %v1118_v12 }
 0x27b   : > { %v1151_v27 = vmax.f32 %v1127_v21, 0.0  ;;  %v1155_v28 = vmax.f32 %v1137_v22, 0.0 }
 0x27c   : > { %v1144_v17 = vmax.f32 %v1109_v13, 0.0  ;;  %v1148_v18 = vmax.f32 %v1119_v14, 0.0 }
 0x27e   : > { %v2853_v19 = vpack.c.bf16 %v1144_v17, %v1143_v15  ;;  %v2863_v20 = vpack.c.bf16 %v1148_v18, %v1147_v16 }
 0x280   : > { %2979 = vst [vmem:[#allocation3] sm:$0xff] %v2853_v19   ;;  %v1128_v23 = vpop.f32.mrf.mxu2  ;;  %v1138_v24 = vpop.f32.mrf.mxu3 }
 0x281   : > { %2981 = vst [vmem:[#allocation3 + $0x10] sm:$0xff] %v2863_v20   ;;  %v1129_v25 = vadd.f32 %v3239_v42, %v1128_v23  ;;  %v1139_v26 = vadd.f32 %v3239_v42, %v1138_v24 }
 0x283   : > { %v1152_v29 = vmax.f32 %v1129_v25, 0.0  ;;  %v1156_v30 = vmax.f32 %v1139_v26, 0.0 }
 0x285   : > { %v2873_v31 = vpack.c.bf16 %v1152_v29, %v1151_v27  ;;  %v2883_v32 = vpack.c.bf16 %v1156_v30, %v1155_v28 }
 0x287   : > { %2983 = vst [vmem:[#allocation3 + $0x20] sm:$0xff] %v2873_v31  }
 0x288   : > { %2985 = vst [vmem:[#allocation3 + $0x38] sm:$0xff] %v2883_v32  }
 0x289 PF: > { %p2428_p13 = scmp.ne.s32.totalorder %s3486_s30, 3 }
 0x28b   : > { %1194 = sbr.rel (%p2428_p13) target bundleno = 849 (0x351), region = 88 }
 0x290   : > { %v2724_v33 = vld [vmem:[#allocation11 + $0x38] sm:$0xff]  ;;  %v2723_v34 = vld [vmem:[#allocation11 + $0x30] sm:$0xff]  ;;  %v2722_v35 = vld [vmem:[#allocation11 + $0x28] sm:$0xff] }
 0x291   : > { %1327 = vmatpush.bf16.msra.mxu0 %v2724_v33  ;;  %3072 = vmatpush.bf16.msra.mxu1 %v2724_v33  ;;  %v2721_v36 = vld [vmem:[#allocation11 + $0x20] sm:$0xff]  ;;  %v2720_v37 = vld [vmem:[#allocation11 + $0x18] sm:$0xff]  ;;  %v2719_v38 = vld [vmem:[#allocation11 + $0x10] sm:$0xff] }
 0x292   : > { %3073 = vmatpush.bf16.msra.mxu2 %v2724_v33  ;;  %3074 = vmatpush.bf16.msra.mxu3 %v2724_v33  ;;  %v2718_v39 = vld [vmem:[#allocation11 + $0x8] sm:$0xff]  ;;  %v2717_v40 = vld [vmem:[#allocation11] sm:$0xff]  ;;  %v2709_v41 = vld [vmem:[#allocation3 + $0x30] sm:$0xff] }
 0x293   : > { %v2711_v42 = vld [vmem:[#allocation3 + $0x18] sm:$0xff]  ;;  %v2713_v43 = vld [vmem:[#allocation3 + $0x8] sm:$0xff]  ;;  %v2710_v45 = vld [vmem:[#allocation3] sm:$0xff] }
 0x294   : > { %v2715_v44 = vld [vmem:[#allocation3 + $0x28] sm:$0xff]  ;;  %v2712_v46 = vld [vmem:[#allocation3 + $0x10] sm:$0xff]  ;;  %v2714_v47 = vld [vmem:[#allocation3 + $0x20] sm:$0xff] }
 0x295   : > { %1328 = vmatpush.bf16.msra.mxu0 %v2723_v34  ;;  %3075 = vmatpush.bf16.msra.mxu1 %v2723_v34  ;;  %v2716_v48 = vld [vmem:[#allocation3 + $0x38] sm:$0xff] }
 0x296   : > { %3076 = vmatpush.bf16.msra.mxu2 %v2723_v34  ;;  %3077 = vmatpush.bf16.msra.mxu3 %v2723_v34 }
 0x299   : > { %1329 = vmatpush.bf16.msra.mxu0 %v2722_v35  ;;  %3078 = vmatpush.bf16.msra.mxu1 %v2722_v35 }
 0x29a   : > { %3079 = vmatpush.bf16.msra.mxu2 %v2722_v35  ;;  %3080 = vmatpush.bf16.msra.mxu3 %v2722_v35 }
 0x29d   : > { %1330 = vmatpush.bf16.msra.mxu0 %v2721_v36  ;;  %3081 = vmatpush.bf16.msra.mxu1 %v2721_v36 }
 0x29e   : > { %3082 = vmatpush.bf16.msra.mxu2 %v2721_v36  ;;  %3083 = vmatpush.bf16.msra.mxu3 %v2721_v36 }
 0x2a1   : > { %1331 = vmatpush.bf16.msra.mxu0 %v2720_v37  ;;  %3084 = vmatpush.bf16.msra.mxu1 %v2720_v37 }
 0x2a2   : > { %3085 = vmatpush.bf16.msra.mxu2 %v2720_v37  ;;  %3086 = vmatpush.bf16.msra.mxu3 %v2720_v37 }
 0x2a5   : > { %1332 = vmatpush.bf16.msra.mxu0 %v2719_v38  ;;  %3087 = vmatpush.bf16.msra.mxu1 %v2719_v38 }
 0x2a6   : > { %3088 = vmatpush.bf16.msra.mxu2 %v2719_v38  ;;  %3089 = vmatpush.bf16.msra.mxu3 %v2719_v38 }
 0x2a9   : > { %1333 = vmatpush.bf16.msra.mxu0 %v2718_v39  ;;  %3090 = vmatpush.bf16.msra.mxu1 %v2718_v39 }
 0x2aa   : > { %3091 = vmatpush.bf16.msra.mxu2 %v2718_v39  ;;  %3092 = vmatpush.bf16.msra.mxu3 %v2718_v39 }
 0x2ad   : > { %1334 = vmatpush.bf16.msra.mxu0 %v2717_v40  ;;  %3093 = vmatpush.bf16.msra.mxu1 %v2717_v40 }
 0x2ae   : > { %3094 = vmatpush.bf16.msra.mxu2 %v2717_v40  ;;  %3095 = vmatpush.bf16.msra.mxu3 %v2717_v40 }
 0x2b0   : > { %1335 = vmatmul.bf16.vlgmr.msra.gmra.mxu0 %v2709_v41  ;;  %1345 = vmatmul.bf16.vlgmr.msra.gmra.mxu1 %v2711_v42 }
 0x2b1   : > { %1355 = vmatmul.bf16.vlgmr.msra.gmra.mxu2 %v2713_v43  ;;  %1365 = vmatmul.bf16.vlgmr.msra.gmra.mxu3 %v2715_v44 }
 0x2c0   : > { %1340 = vmatmul.bf16.gmra.mxu0 %v2710_v45  ;;  %1350 = vmatmul.bf16.gmra.mxu1 %v2712_v46 }
 0x2c1   : > { %1360 = vmatmul.bf16.gmra.mxu2 %v2714_v47  ;;  %1370 = vmatmul.bf16.gmra.mxu3 %v2716_v48 }
 0x32d   : > { %v1336_v49 = vpop.f32.mrf.mxu0  ;;  %v1346_v50 = vpop.f32.mrf.mxu1 }
 0x334   : > { %v1356_v51 = vpop.f32.mrf.mxu2  ;;  %v1366_v52 = vpop.f32.mrf.mxu3 }
 0x335   : > { %v1338_v53 = vpop.f32.mrf.mxu0  ;;  %v1348_v54 = vpop.f32.mrf.mxu1 }
 0x336   : > { %v2888_v55 = vpack.c.bf16 %v1338_v53, %v1336_v49  ;;  %v2898_v56 = vpack.c.bf16 %v1348_v54, %v1346_v50 }
 0x338   : > { %2889 = vst [vmem:[#allocation4] sm:$0xff] %v2888_v55  }
 0x339   : > { %2987 = vst [vmem:[#allocation4 + $0x10] sm:$0xff] %v2898_v56  }
 0x33c   : > { %v1358_v57 = vpop.f32.mrf.mxu2  ;;  %v1368_v58 = vpop.f32.mrf.mxu3 }
 0x33d   : > { %v2908_v59 = vpack.c.bf16 %v1358_v57, %v1356_v51  ;;  %v2918_v60 = vpack.c.bf16 %v1368_v58, %v1366_v52  ;;  %v1341_v61 = vpop.f32.mrf.mxu0  ;;  %v1351_v62 = vpop.f32.mrf.mxu1 }
 0x33f   : > { %2989 = vst [vmem:[#allocation4 + $0x28] sm:$0xff] %v2908_v59  }
 0x340   : > { %2991 = vst [vmem:[#allocation4 + $0x30] sm:$0xff] %v2918_v60  }
 0x344   : > { %v1361_v63 = vpop.f32.mrf.mxu2  ;;  %v1371_v0 = vpop.f32.mrf.mxu3 }
 0x345   : > { %v1343_v1 = vpop.f32.mrf.mxu0  ;;  %v1353_v2 = vpop.f32.mrf.mxu1 }
 0x346   : > { %v2893_v3 = vpack.c.bf16 %v1343_v1, %v1341_v61  ;;  %v2903_v4 = vpack.c.bf16 %v1353_v2, %v1351_v62 }
 0x348   : > { %2986 = vst [vmem:[#allocation4 + $0x18] sm:$0xff] %v2893_v3  }
 0x349   : > { %2988 = vst [vmem:[#allocation4 + $0x20] sm:$0xff] %v2903_v4  }
 0x34c   : > { %v1363_v5 = vpop.f32.mrf.mxu2  ;;  %v1373_v6 = vpop.f32.mrf.mxu3 }
 0x34d   : > { %v2913_v7 = vpack.c.bf16 %v1363_v5, %v1361_v63  ;;  %v2923_v8 = vpack.c.bf16 %v1373_v6, %v1371_v0 }
 0x34f   : > { %2990 = vst [vmem:[#allocation4 + $0x8] sm:$0xff] %v2913_v7  }
 0x350   : > { %2992 = vst [vmem:[#allocation4 + $0x38] sm:$0xff] %v2923_v8  }
 0x351 PF: > { %p2493_p0 = scmp.ne.s32.totalorder %s3486_s30, 4 }
 0x353   : > { %1413 = sbr.rel (%p2493_p0) target bundleno = 1049 (0x419), region = 92 }
 0x358   : > { %v2740_v9 = vld [vmem:[#allocation4 + $0x38] sm:$0xff]  ;;  %v2739_v10 = vld [vmem:[#allocation4 + $0x30] sm:$0xff]  ;;  %v2738_v11 = vld [vmem:[#allocation4 + $0x8] sm:$0xff] }
 0x359   : > { %1546 = vmatpush.bf16.msra.mxu0 %v2740_v9  ;;  %3096 = vmatpush.bf16.msra.mxu1 %v2740_v9  ;;  %v2737_v12 = vld [vmem:[#allocation4 + $0x28] sm:$0xff]  ;;  %v2736_v13 = vld [vmem:[#allocation4 + $0x20] sm:$0xff]  ;;  %v2735_v14 = vld [vmem:[#allocation4 + $0x10] sm:$0xff] }
 0x35a   : > { %3097 = vmatpush.bf16.msra.mxu2 %v2740_v9  ;;  %3098 = vmatpush.bf16.msra.mxu3 %v2740_v9  ;;  %v2734_v15 = vld [vmem:[#allocation4 + $0x18] sm:$0xff]  ;;  %v2733_v16 = vld [vmem:[#allocation4] sm:$0xff]  ;;  %v2727_v18 = vld [vmem:[#allocation2 + $0x10] sm:$0xff] }
 0x35b   : > { %v2725_v17 = vld [vmem:[#allocation2] sm:$0xff]  ;;  %v2731_v20 = vld [vmem:[#allocation2 + $0x30] sm:$0xff]  ;;  %v2726_v21 = vld [vmem:[#allocation2 + $0x8] sm:$0xff] }
 0x35c   : > { %v2729_v19 = vld [vmem:[#allocation2 + $0x20] sm:$0xff]  ;;  %v2728_v22 = vld [vmem:[#allocation2 + $0x18] sm:$0xff]  ;;  %v2730_v23 = vld [vmem:[#allocation2 + $0x28] sm:$0xff] }
 0x35d   : > { %1547 = vmatpush.bf16.msra.mxu0 %v2739_v10  ;;  %3099 = vmatpush.bf16.msra.mxu1 %v2739_v10  ;;  %v2732_v24 = vld [vmem:[#allocation2 + $0x38] sm:$0xff] }
 0x35e   : > { %3100 = vmatpush.bf16.msra.mxu2 %v2739_v10  ;;  %3101 = vmatpush.bf16.msra.mxu3 %v2739_v10 }
 0x361   : > { %1548 = vmatpush.bf16.msra.mxu0 %v2738_v11  ;;  %3102 = vmatpush.bf16.msra.mxu1 %v2738_v11 }
 0x362   : > { %3103 = vmatpush.bf16.msra.mxu2 %v2738_v11  ;;  %3104 = vmatpush.bf16.msra.mxu3 %v2738_v11 }
 0x365   : > { %1549 = vmatpush.bf16.msra.mxu0 %v2737_v12  ;;  %3105 = vmatpush.bf16.msra.mxu1 %v2737_v12 }
 0x366   : > { %3106 = vmatpush.bf16.msra.mxu2 %v2737_v12  ;;  %3107 = vmatpush.bf16.msra.mxu3 %v2737_v12 }
 0x369   : > { %1550 = vmatpush.bf16.msra.mxu0 %v2736_v13  ;;  %3108 = vmatpush.bf16.msra.mxu1 %v2736_v13 }
 0x36a   : > { %3109 = vmatpush.bf16.msra.mxu2 %v2736_v13  ;;  %3110 = vmatpush.bf16.msra.mxu3 %v2736_v13 }
 0x36d   : > { %1551 = vmatpush.bf16.msra.mxu0 %v2735_v14  ;;  %3111 = vmatpush.bf16.msra.mxu1 %v2735_v14 }
 0x36e   : > { %3112 = vmatpush.bf16.msra.mxu2 %v2735_v14  ;;  %3113 = vmatpush.bf16.msra.mxu3 %v2735_v14 }
 0x371   : > { %1552 = vmatpush.bf16.msra.mxu0 %v2734_v15  ;;  %3114 = vmatpush.bf16.msra.mxu1 %v2734_v15 }
 0x372   : > { %3115 = vmatpush.bf16.msra.mxu2 %v2734_v15  ;;  %3116 = vmatpush.bf16.msra.mxu3 %v2734_v15 }
 0x375   : > { %1553 = vmatpush.bf16.msra.mxu0 %v2733_v16  ;;  %3117 = vmatpush.bf16.msra.mxu1 %v2733_v16 }
 0x376   : > { %3118 = vmatpush.bf16.msra.mxu2 %v2733_v16  ;;  %3119 = vmatpush.bf16.msra.mxu3 %v2733_v16 }
 0x378   : > { %1554 = vmatmul.bf16.vlgmr.msra.gmra.mxu0 %v2725_v17  ;;  %1564 = vmatmul.bf16.vlgmr.msra.gmra.mxu1 %v2727_v18 }
 0x379   : > { %1574 = vmatmul.bf16.vlgmr.msra.gmra.mxu2 %v2729_v19  ;;  %1584 = vmatmul.bf16.vlgmr.msra.gmra.mxu3 %v2731_v20 }
 0x388   : > { %1559 = vmatmul.bf16.gmra.mxu0 %v2726_v21  ;;  %1569 = vmatmul.bf16.gmra.mxu1 %v2728_v22 }
 0x389   : > { %1579 = vmatmul.bf16.gmra.mxu2 %v2730_v23  ;;  %1589 = vmatmul.bf16.gmra.mxu3 %v2732_v24 }
 0x3f5   : > { %v1555_v25 = vpop.f32.mrf.mxu0  ;;  %v1565_v26 = vpop.f32.mrf.mxu1 }
 0x3fc   : > { %v1575_v27 = vpop.f32.mrf.mxu2  ;;  %v1585_v28 = vpop.f32.mrf.mxu3 }
 0x3fd   : > { %v1557_v29 = vpop.f32.mrf.mxu0  ;;  %v1567_v30 = vpop.f32.mrf.mxu1 }
 0x3fe   : > { %v2928_v31 = vpack.c.bf16 %v1557_v29, %v1555_v25  ;;  %v2938_v32 = vpack.c.bf16 %v1567_v30, %v1565_v26 }
 0x400   : > { %2929 = vst [vmem:[#allocation3 + $0x30] sm:$0xff] %v2928_v31  }
 0x401   : > { %2994 = vst [vmem:[#allocation3 + $0x18] sm:$0xff] %v2938_v32  }
 0x404   : > { %v1577_v33 = vpop.f32.mrf.mxu2  ;;  %v1587_v34 = vpop.f32.mrf.mxu3 }
 0x405   : > { %v2948_v35 = vpack.c.bf16 %v1577_v33, %v1575_v27  ;;  %v2958_v36 = vpack.c.bf16 %v1587_v34, %v1585_v28  ;;  %v1560_v37 = vpop.f32.mrf.mxu0  ;;  %v1570_v38 = vpop.f32.mrf.mxu1 }
 0x407   : > { %2996 = vst [vmem:[#allocation3 + $0x8] sm:$0xff] %v2948_v35  }
 0x408   : > { %2998 = vst [vmem:[#allocation3 + $0x28] sm:$0xff] %v2958_v36  }
 0x40c   : > { %v1580_v39 = vpop.f32.mrf.mxu2  ;;  %v1590_v40 = vpop.f32.mrf.mxu3 }
 0x40d   : > { %v1562_v41 = vpop.f32.mrf.mxu0  ;;  %v1572_v42 = vpop.f32.mrf.mxu1 }
 0x40e   : > { %v2933_v43 = vpack.c.bf16 %v1562_v41, %v1560_v37  ;;  %v2943_v44 = vpack.c.bf16 %v1572_v42, %v1570_v38 }
 0x410   : > { %2993 = vst [vmem:[#allocation3] sm:$0xff] %v2933_v43  }
 0x411   : > { %2995 = vst [vmem:[#allocation3 + $0x10] sm:$0xff] %v2943_v44  }
 0x414   : > { %v1582_v45 = vpop.f32.mrf.mxu2  ;;  %v1592_v46 = vpop.f32.mrf.mxu3 }
 0x415   : > { %v2953_v47 = vpack.c.bf16 %v1582_v45, %v1580_v39  ;;  %v2963_v48 = vpack.c.bf16 %v1592_v46, %v1590_v40 }
 0x417   : > { %2997 = vst [vmem:[#allocation3 + $0x20] sm:$0xff] %v2953_v47  }
 0x418   : > { %2999 = vst [vmem:[#allocation3 + $0x38] sm:$0xff] %v2963_v48  }
 0x419 PF: > { %p2558_p1 = scmp.ne.s32.totalorder %s3486_s30, 5 }
 0x41b   : > { %1632 = sbr.rel (%p2558_p1) target bundleno = 1425 (0x591), region = 96 }
 0x420   : > { %v2756_v49 = vld [vmem:[#allocation3 + $0x38] sm:$0xff]  ;;  %v2755_v50 = vld [vmem:[#allocation3 + $0x28] sm:$0xff]  ;;  %v2754_v51 = vld [vmem:[#allocation3 + $0x20] sm:$0xff] }
 0x421   : > { %1769 = vmatpush.bf16.msra.mxu0 %v2756_v49  ;;  %3120 = vmatpush.bf16.msra.mxu2 %v2756_v49  ;;  %v2753_v52 = vld [vmem:[#allocation3 + $0x8] sm:$0xff]  ;;  %v2752_v53 = vld [vmem:[#allocation3 + $0x10] sm:$0xff]  ;;  %v2751_v54 = vld [vmem:[#allocation3 + $0x18] sm:$0xff] }
 0x422   : > { %v2750_v55 = vld [vmem:[#allocation3] sm:$0xff]  ;;  %v2749_v56 = vld [vmem:[#allocation3 + $0x30] sm:$0xff]  ;;  %v2742_v59 = vld [vmem:[#allocation2 + $0x8] sm:$0xff] }
 0x423   : > { %v2741_v57 = vld [vmem:[#allocation2] sm:$0xff]  ;;  %v2746_v60 = vld [vmem:[#allocation2 + $0x28] sm:$0xff]  ;;  %v2764_v61 = vld [vmem:[#allocation13 + $0x38] sm:$0xff] }
 0x424   : > { %v2745_v58 = vld [vmem:[#allocation2 + $0x20] sm:$0xff]  ;;  %1926 = vmatpush.bf16.msra.mxu1 %v2764_v61  ;;  %v2763_v62 = vld [vmem:[#allocation13 + $0x30] sm:$0xff]  ;;  %3128 = vmatpush.bf16.msra.mxu3 %v2764_v61  ;;  %v2762_v63 = vld [vmem:[#allocation13 + $0x28] sm:$0xff] }
 0x425   : > { %1770 = vmatpush.bf16.msra.mxu0 %v2755_v50  ;;  %3121 = vmatpush.bf16.msra.mxu2 %v2755_v50  ;;  %v2761_v0 = vld [vmem:[#allocation13 + $0x20] sm:$0xff]  ;;  %v2743_v1 = vld [vmem:[#allocation2 + $0x10] sm:$0xff]  ;;  %v2744_v3 = vld [vmem:[#allocation2 + $0x18] sm:$0xff] }
 0x426   : > { %v2747_v2 = vld [vmem:[#allocation2 + $0x30] sm:$0xff]  ;;  %v2748_v4 = vld [vmem:[#allocation2 + $0x38] sm:$0xff]  ;;  %v2758_v7 = vld [vmem:[#allocation13 + $0x8] sm:$0xff] }
 0x427   : > { %v2760_v5 = vld [vmem:[#allocation13 + $0x18] sm:$0xff]  ;;  %v2759_v6 = vld [vmem:[#allocation13 + $0x10] sm:$0xff]  ;;  %v2757_v8 = vld [vmem:[#allocation13] sm:$0xff] }
 0x428   : > { %1927 = vmatpush.bf16.msra.mxu1 %v2763_v62  ;;  %3129 = vmatpush.bf16.msra.mxu3 %v2763_v62  ;;  %v3664_v9 = vld [vmem:[%s3713_s5] ss:$0 sm:$0xff] }
 0x429   : > { %1771 = vmatpush.bf16.msra.mxu0 %v2754_v51  ;;  %3122 = vmatpush.bf16.msra.mxu2 %v2754_v51 }
 0x42c   : > { %1928 = vmatpush.bf16.msra.mxu1 %v2762_v63  ;;  %3130 = vmatpush.bf16.msra.mxu3 %v2762_v63 }
 0x42d   : > { %1772 = vmatpush.bf16.msra.mxu0 %v2753_v52  ;;  %3123 = vmatpush.bf16.msra.mxu2 %v2753_v52 }
 0x430   : > { %1929 = vmatpush.bf16.msra.mxu1 %v2761_v0  ;;  %3131 = vmatpush.bf16.msra.mxu3 %v2761_v0 }
 0x431   : > { %1773 = vmatpush.bf16.msra.mxu0 %v2752_v53  ;;  %3124 = vmatpush.bf16.msra.mxu2 %v2752_v53 }
 0x434   : > { %1930 = vmatpush.bf16.msra.mxu1 %v2760_v5  ;;  %3132 = vmatpush.bf16.msra.mxu3 %v2760_v5 }
 0x435   : > { %1774 = vmatpush.bf16.msra.mxu0 %v2751_v54  ;;  %3125 = vmatpush.bf16.msra.mxu2 %v2751_v54 }
 0x438   : > { %1931 = vmatpush.bf16.msra.mxu1 %v2759_v6  ;;  %3133 = vmatpush.bf16.msra.mxu3 %v2759_v6 }
 0x439   : > { %1775 = vmatpush.bf16.msra.mxu0 %v2750_v55  ;;  %3126 = vmatpush.bf16.msra.mxu2 %v2750_v55 }
 0x43c   : > { %1932 = vmatpush.bf16.msra.mxu1 %v2758_v7  ;;  %3134 = vmatpush.bf16.msra.mxu3 %v2758_v7 }
 0x43d   : > { %1776 = vmatpush.bf16.msra.mxu0 %v2749_v56  ;;  %3127 = vmatpush.bf16.msra.mxu2 %v2749_v56 }
 0x440   : > { %1777 = vmatmul.bf16.vlgmr.msra.gmra.mxu0 %v2741_v57  ;;  %1797 = vmatmul.bf16.vlgmr.msra.gmra.mxu2 %v2745_v58 }
 0x441   : > { %1933 = vmatpush.bf16.msra.mxu1 %v2757_v8  ;;  %3135 = vmatpush.bf16.msra.mxu3 %v2757_v8 }
 0x450   : > { %1782 = vmatmul.bf16.gmra.mxu0 %v2742_v59  ;;  %1802 = vmatmul.bf16.gmra.mxu2 %v2746_v60 }
 0x460   : > { %1787 = vmatmul.bf16.gmra.mxu0 %v2743_v1  ;;  %1807 = vmatmul.bf16.gmra.mxu2 %v2747_v2  ;;  %v3241_v2 = vld [vmem:[%s3715_s7] ss:$0 sm:$0xff] }
 0x470   : > { %1792 = vmatmul.bf16.gmra.mxu0 %v2744_v3  ;;  %1812 = vmatmul.bf16.gmra.mxu2 %v2748_v4 }
 0x4bd   : > { %v1778_v10 = vpop.f32.mrf.mxu0 }
 0x4be   : > { %v1779_v11 = vadd.f32 %v3664_v9, %v1778_v10 }
 0x4c0   : > { %v1818_v12 = vmax.f32 %v1779_v11, 0.0 }
 0x4c2   : > { %1834 = vst [vmem:[#allocation14] sm:$0xff] %v1818_v12 }
 0x4c3   : > { %v1798_v13 = vpop.f32.mrf.mxu2 }
 0x4c4   : > { %v1799_v14 = vadd.f32 %v3664_v9, %v1798_v13 }
 0x4c5   : > { %v1780_v15 = vpop.f32.mrf.mxu0 }
 0x4c6   : > { %v1826_v16 = vmax.f32 %v1799_v14, 0.0  ;;  %v1781_v17 = vadd.f32 %v3664_v9, %v1780_v15 }
 0x4c8   : > { %1842 = vst [vmem:[#allocation14 + $0x40] sm:$0xff] %v1826_v16  ;;  %v1819_v18 = vmax.f32 %v1781_v17, 0.0 }
 0x4ca   : > { %1835 = vst [vmem:[#allocation14 + $0x8] sm:$0xff] %v1819_v18  ;;  %v1850_v19 = vpack.c.bf16 %v1819_v18, %v1818_v12 }
 0x4cb   : > { %v1800_v20 = vpop.f32.mrf.mxu2 }
 0x4cc   : > { %v1801_v21 = vadd.f32 %v3664_v9, %v1800_v20  ;;  %1934 = vmatmul.bf16.vlgmr.msra.gmra.mxu1 %v1850_v19 }
 0x4cd   : > { %v1783_v22 = vpop.f32.mrf.mxu0 }
 0x4ce   : > { %v1827_v23 = vmax.f32 %v1801_v21, 0.0  ;;  %v1784_v24 = vadd.f32 %v3664_v9, %v1783_v22 }
 0x4d0   : > { %1843 = vst [vmem:[#allocation14 + $0x48] sm:$0xff] %v1827_v23  ;;  %v1820_v25 = vmax.f32 %v1784_v24, 0.0  ;;  %v1854_v26 = vpack.c.bf16 %v1827_v23, %v1826_v16 }
 0x4d2   : > { %1836 = vst [vmem:[#allocation14 + $0x10] sm:$0xff] %v1820_v25  ;;  %1954 = vmatmul.bf16.vlgmr.msra.gmra.mxu3 %v1854_v26 }
 0x4d3   : > { %v1803_v27 = vpop.f32.mrf.mxu2 }
 0x4d4   : > { %v1804_v28 = vadd.f32 %v3664_v9, %v1803_v27 }
 0x4d5   : > { %v1785_v29 = vpop.f32.mrf.mxu0 }
 0x4d6   : > { %v1828_v30 = vmax.f32 %v1804_v28, 0.0  ;;  %v1786_v31 = vadd.f32 %v3664_v9, %v1785_v29 }
 0x4d8   : > { %1844 = vst [vmem:[#allocation14 + $0x50] sm:$0xff] %v1828_v30  ;;  %v1821_v32 = vmax.f32 %v1786_v31, 0.0 }
 0x4da   : > { %1837 = vst [vmem:[#allocation14 + $0x18] sm:$0xff] %v1821_v32  ;;  %v1851_v33 = vpack.c.bf16 %v1821_v32, %v1820_v25 }
 0x4db   : > { %v1805_v34 = vpop.f32.mrf.mxu2 }
 0x4dc   : > { %v1806_v35 = vadd.f32 %v3664_v9, %v1805_v34  ;;  %1939 = vmatmul.bf16.gmra.mxu1 %v1851_v33 }
 0x4dd   : > { %v1788_v36 = vpop.f32.mrf.mxu0 }
 0x4de   : > { %v1829_v37 = vmax.f32 %v1806_v35, 0.0  ;;  %v1789_v38 = vadd.f32 %v3664_v9, %v1788_v36 }
 0x4e0   : > { %1845 = vst [vmem:[#allocation14 + $0x58] sm:$0xff] %v1829_v37  ;;  %v1822_v39 = vmax.f32 %v1789_v38, 0.0  ;;  %v1855_v40 = vpack.c.bf16 %v1829_v37, %v1828_v30 }
 0x4e2   : > { %1838 = vst [vmem:[#allocation14 + $0x20] sm:$0xff] %v1822_v39  ;;  %1959 = vmatmul.bf16.gmra.mxu3 %v1855_v40 }
 0x4e3   : > { %v1808_v41 = vpop.f32.mrf.mxu2 }
 0x4e4   : > { %v1809_v42 = vadd.f32 %v3664_v9, %v1808_v41 }
 0x4e5   : > { %v1790_v43 = vpop.f32.mrf.mxu0 }
 0x4e6   : > { %v1830_v44 = vmax.f32 %v1809_v42, 0.0  ;;  %v1791_v45 = vadd.f32 %v3664_v9, %v1790_v43 }
 0x4e8   : > { %1846 = vst [vmem:[#allocation14 + $0x60] sm:$0xff] %v1830_v44  ;;  %v1823_v46 = vmax.f32 %v1791_v45, 0.0 }
 0x4ea   : > { %1839 = vst [vmem:[#allocation14 + $0x28] sm:$0xff] %v1823_v46  ;;  %v1852_v47 = vpack.c.bf16 %v1823_v46, %v1822_v39 }
 0x4eb   : > { %v1810_v48 = vpop.f32.mrf.mxu2 }
 0x4ec   : > { %v1811_v49 = vadd.f32 %v3664_v9, %v1810_v48  ;;  %1944 = vmatmul.bf16.gmra.mxu1 %v1852_v47 }
 0x4ed   : > { %v1793_v50 = vpop.f32.mrf.mxu0 }
 0x4ee   : > { %v1831_v51 = vmax.f32 %v1811_v49, 0.0  ;;  %v1794_v52 = vadd.f32 %v3664_v9, %v1793_v50 }
 0x4f0   : > { %1847 = vst [vmem:[#allocation14 + $0x68] sm:$0xff] %v1831_v51  ;;  %v1824_v53 = vmax.f32 %v1794_v52, 0.0  ;;  %v1856_v54 = vpack.c.bf16 %v1831_v51, %v1830_v44 }
 0x4f2   : > { %1840 = vst [vmem:[#allocation14 + $0x30] sm:$0xff] %v1824_v53  ;;  %1964 = vmatmul.bf16.gmra.mxu3 %v1856_v54 }
 0x4f3   : > { %v1813_v55 = vpop.f32.mrf.mxu2 }
 0x4f4   : > { %v1814_v56 = vadd.f32 %v3664_v9, %v1813_v55 }
 0x4f5   : > { %v1795_v57 = vpop.f32.mrf.mxu0 }
 0x4f6   : > { %v1832_v58 = vmax.f32 %v1814_v56, 0.0  ;;  %v1796_v59 = vadd.f32 %v3664_v9, %v1795_v57 }
 0x4f8   : > { %1848 = vst [vmem:[#allocation14 + $0x70] sm:$0xff] %v1832_v58  ;;  %v1825_v60 = vmax.f32 %v1796_v59, 0.0 }
 0x4fa   : > { %1841 = vst [vmem:[#allocation14 + $0x38] sm:$0xff] %v1825_v60  ;;  %v1853_v61 = vpack.c.bf16 %v1825_v60, %v1824_v53 }
 0x4fb   : > { %v1815_v62 = vpop.f32.mrf.mxu2 }
 0x4fc   : > { %v1816_v63 = vadd.f32 %v3664_v9, %v1815_v62  ;;  %1949 = vmatmul.bf16.gmra.mxu1 %v1853_v61 }
 0x4fe   : > { %v1833_v0 = vmax.f32 %v1816_v63, 0.0 }
 0x500   : > { %1849 = vst [vmem:[#allocation14 + $0x78] sm:$0xff] %v1833_v0  ;;  %v1857_v1 = vpack.c.bf16 %v1833_v0, %v1832_v58 }
 0x502   : > { %1969 = vmatmul.bf16.gmra.mxu3 %v1857_v1 }
 0x549   : > { %v1935_v3 = vpop.f32.mrf.mxu1 }
 0x54a   : > { %v1936_v4 = vadd.f32 %v3241_v2, %v1935_v3 }
 0x54c   : > { %1975 = vst [vmem:[#allocation15] sm:$0xff] %v1936_v4 }
 0x551   : > { %v1937_v5 = vpop.f32.mrf.mxu1 }
 0x552   : > { %v1938_v6 = vadd.f32 %v3241_v2, %v1937_v5 }
 0x554   : > { %1976 = vst [vmem:[#allocation15 + $0x8] sm:$0xff] %v1938_v6 }
 0x555   : > { %v1955_v7 = vpop.f32.mrf.mxu3 }
 0x556   : > { %v1956_v8 = vadd.f32 %v3241_v2, %v1955_v7 }
 0x558   : > { %1983 = vst [vmem:[#allocation15 + $0x40] sm:$0xff] %v1956_v8 }
 0x559   : > { %v1940_v10 = vpop.f32.mrf.mxu1 }
 0x55a   : > { %v1941_v9 = vadd.f32 %v3241_v2, %v1940_v10 }
 0x55c   : > { %1977 = vst [vmem:[#allocation15 + $0x10] sm:$0xff] %v1941_v9 }
 0x55d   : > { %v1957_v11 = vpop.f32.mrf.mxu3 }
 0x55e   : > { %v1958_v12 = vadd.f32 %v3241_v2, %v1957_v11 }
 0x560   : > { %1984 = vst [vmem:[#allocation15 + $0x48] sm:$0xff] %v1958_v12 }
 0x561   : > { %v1942_v13 = vpop.f32.mrf.mxu1 }
 0x562   : > { %v1943_v14 = vadd.f32 %v3241_v2, %v1942_v13 }
 0x564   : > { %1978 = vst [vmem:[#allocation15 + $0x18] sm:$0xff] %v1943_v14 }
 0x565   : > { %v1960_v15 = vpop.f32.mrf.mxu3 }
 0x566   : > { %v1961_v16 = vadd.f32 %v3241_v2, %v1960_v15 }
 0x568   : > { %1985 = vst [vmem:[#allocation15 + $0x50] sm:$0xff] %v1961_v16 }
 0x569   : > { %v1945_v17 = vpop.f32.mrf.mxu1 }
 0x56a   : > { %v1946_v18 = vadd.f32 %v3241_v2, %v1945_v17 }
 0x56c   : > { %1979 = vst [vmem:[#allocation15 + $0x20] sm:$0xff] %v1946_v18 }
 0x56d   : > { %v1962_v19 = vpop.f32.mrf.mxu3 }
 0x56e   : > { %v1963_v20 = vadd.f32 %v3241_v2, %v1962_v19 }
 0x570   : > { %1986 = vst [vmem:[#allocation15 + $0x58] sm:$0xff] %v1963_v20 }
 0x571   : > { %v1947_v21 = vpop.f32.mrf.mxu1 }
 0x572   : > { %v1948_v22 = vadd.f32 %v3241_v2, %v1947_v21 }
 0x574   : > { %1980 = vst [vmem:[#allocation15 + $0x28] sm:$0xff] %v1948_v22 }
 0x575   : > { %v1965_v23 = vpop.f32.mrf.mxu3 }
 0x576   : > { %v1966_v24 = vadd.f32 %v3241_v2, %v1965_v23 }
 0x578   : > { %1987 = vst [vmem:[#allocation15 + $0x60] sm:$0xff] %v1966_v24 }
 0x579   : > { %v1950_v25 = vpop.f32.mrf.mxu1 }
 0x57a   : > { %v1951_v26 = vadd.f32 %v3241_v2, %v1950_v25 }
 0x57c   : > { %1981 = vst [vmem:[#allocation15 + $0x30] sm:$0xff] %v1951_v26 }
 0x57d   : > { %v1967_v27 = vpop.f32.mrf.mxu3 }
 0x57e   : > { %v1968_v28 = vadd.f32 %v3241_v2, %v1967_v27 }
 0x580   : > { %1988 = vst [vmem:[#allocation15 + $0x68] sm:$0xff] %v1968_v28 }
 0x581   : > { %v1952_v29 = vpop.f32.mrf.mxu1 }
 0x582   : > { %v1953_v30 = vadd.f32 %v3241_v2, %v1952_v29 }
 0x584   : > { %1982 = vst [vmem:[#allocation15 + $0x38] sm:$0xff] %v1953_v30 }
 0x585   : > { %v1970_v31 = vpop.f32.mrf.mxu3 }
 0x586   : > { %v1971_v32 = vadd.f32 %v3241_v2, %v1970_v31 }
 0x588   : > { %1989 = vst [vmem:[#allocation15 + $0x70] sm:$0xff] %v1971_v32 }
 0x58d   : > { %v1972_v33 = vpop.f32.mrf.mxu3 }
 0x58e   : > { %v1973_v34 = vadd.f32 %v3241_v2, %v1972_v33 }
 0x590   : > { %1990 = vst [vmem:[#allocation15 + $0x78] sm:$0xff] %v1973_v34 }
 0x591 PF: > { %p3199_p2 = scmp.eq.s32.totalorder %s3573_s12, 5  ;;  %s2013_s28 = sshll.u32 %s3716_s8, 4  ;;  %s2014_s28 = int_to_ptr.hbm [resolvable:$true] %s2013_s28 }
 0x592   : > { %s3503_s16 = smov [#allocation14]   ;;  %s3504_s21 = smov 128  }
 0x593   : > { %s2011_s19 = sshll.u32 %s3503_s16, 4  ;;  %s3505_s18 = smov 8   ;;  %s2012_s19 = int_to_ptr.vmem [resolvable:$true] %s2011_s19 }
 0x594   : > { %3157 = dma.vmem_to_hbm [thread:$0]  (%p3199_p2), %s2012_s19, 2048, %s2014_s28, [#allocation7], %s3504_s21, %s3504_s21, %s3505_s18  }
 0x595   : > { %s3506_s20 = smov [#allocation15]   ;;  %s2032_s25 = sshll.u32 %s3717_s9, 4  ;;  %s2033_s25 = int_to_ptr.hbm [resolvable:$true] %s2032_s25 }
 0x596   : > { %s2030_s17 = sshll.u32 %s3506_s20, 4  ;;  %s2031_s17 = int_to_ptr.vmem [resolvable:$true] %s2030_s17 }
 0x597   : > { %3159 = dma.vmem_to_hbm [thread:$0]  (%p3199_p2), %s2031_s17, 2048, %s2033_s25, [#allocation16], %s3504_s21, %s3504_s21, %s3505_s18  }
 0x598 PF: > { %p3201_p3 = scmp.ge.s32.totalorder %s3494_s11, 2  ;;  %p3202_p4 = scmp.eq.s32.totalorder %s2219_s13, 5 }
 0x59a   : > { %p3182_p5 = pnand %p3202_p4, %p3201_p3 }
 0x59c   : > { %p3183_p6 = pneg %p3182_p5 }
 0x59e   : > { %3477 = dma.done.wait (%p3183_p6), [#allocation7], 2048  }
 0x59f   : > { %3479 = vsyncadd (%p3183_p6), [#allocation7], 4294965248 }
 0x5a0   : > { %3481 = dma.done.wait (%p3183_p6), [#allocation16], 2048  }
 0x5a1   : > { %3483 = vsyncadd (%p3183_p6), [#allocation16], 4294965248  ;;  %s33_s11 = sadd.s32 1, %s3494_s11   ;;  %s3720_s30 = smov %s3490_s10 }
 0x5a2   : > { %p30_p7 = scmp.ge.s32.totalorder %s33_s11, 8   ;;  %s3721_s10 = smov %s3723_s14 }
 0x5a4   :  { %32 = sbr.rel (!%p30_p7) target bundleno = 10 (0xa), region = 173 }
 0x5a9   :  { %2064 = vsyncpa [#allocation6], 1 }
 0x5aa   :  { %2066 = vsyncpa [#allocation6 + $0x1], 1 }
 0x5ab   :  { %2067 = vsyncpa [#allocation9], 1 }
 0x5ac   :  { %2069 = vsyncpa [#allocation9 + $0x1], 1 }
 0x5ad   :  { %2070 = vsyncpa [#allocation12], 1 }
 0x5ae   :  { %2071 = vsyncpa [#allocation7], 1 }
 0x5af   :  { %2073 = vsyncpa [#allocation7 + $0x1], 1 }
 0x5b0   :  { %2074 = vsyncpa [#allocation16], 1 }
 0x5b1   :  { %2076 = vsyncpa [#allocation16 + $0x1], 1 }

</bundles_post_ra>
